<compile_context>
chip_gen: v7x
topology: tpu7x:2x2x1
jax: 0.10.0
libtpu: 0.0.40
codegen_flags: <defaults>
</compile_context>

<pallas_src>
import jax
import jax.numpy as jnp
from jax.experimental import pallas as pl
from jax.experimental.pallas import tpu as pltpu

SILU_SCALE = 1.0 / 0.6


def _scaled_silu(x):
    return jax.nn.sigmoid(x) * x * SILU_SCALE


# --------------------------------------------------------------------------
# Kernel
# --------------------------------------------------------------------------
def gated_equivariant_kernel(
    x_ref,      # (TN, H)
    v_ref,      # (3, TN, H)  spatial-major
    w1_ref,     # (H, H)      vec1_proj weight^T
    w2_ref,     # (H, Opad)   vec2_proj weight^T (lane-padded)
    wu1x_ref,   # (H, H)      update_net[0] weight^T rows [0:H]   (acts on x)
    wu1v_ref,   # (H, H)      update_net[0] weight^T rows [H:2H]  (acts on vec1)
    bu1_ref,    # (1, H)      f32
    wu2_ref,    # (H, 2*Opad) update_net[2] weight^T, [x_head | gate_head], pre-scaled by 1/0.6
    bu2_ref,    # (1, 2*Opad) f32
    xo_ref,     # (TN, Opad)
    vo_ref,     # (3, TN, Opad)
):
    three, tn, H = v_ref.shape
    Opad = xo_ref.shape[-1]

    v = v_ref[...]                                    # (3, TN, H)
    v2d = v.reshape(three * tn, H)                    # sublane stack, free when TN % 8 == 0

    # vec1 = ||vec1_proj(v)||_2 over the spatial axis: one shared MXU call on
    # the stacked slabs; the spatial reduction is two aligned VPU adds.
    p = jnp.dot(v2d, w1_ref[...], preferred_element_type=jnp.float32)
    p = p.reshape(three, tn, H)
    sq = p * p
    vec1 = jnp.sqrt(sq[0] + sq[1] + sq[2])            # (TN, H) f32

    # vec2 = vec2_proj(v) -> (3, TN, Opad)
    vec2 = jnp.dot(v2d, w2_ref[...], preferred_element_type=jnp.float32)
    vec2 = vec2.reshape(three, tn, Opad)
    # TODO(synk): when H % 128 == 0, fuse w1|w2 column-wise into one
    # (H, H+Opad) matmul to halve LHS streaming of v2d.

    # update_net[0](cat[x, vec1]) without a lane-axis concat.
    x = x_ref[...]
    pre = (
        jnp.dot(x, wu1x_ref[...], preferred_element_type=jnp.float32)
        + jnp.dot(vec1.astype(wu1v_ref.dtype), wu1v_ref[...],
                  preferred_element_type=jnp.float32)
        + bu1_ref[...]
    )
    # Plain SiLU here: ScaledSiLU's 1/0.6 is folded into wu2's columns.
    h = (jax.nn.sigmoid(pre) * pre).astype(wu2_ref.dtype)

    # Fused update_net[2]: one (TN, H) @ (H, 2*Opad) matmul; the split at Opad
    # is lane-aligned because Opad % 128 == 0.
    out2 = jnp.dot(h, wu2_ref[...], preferred_element_type=jnp.float32) + bu2_ref[...]
    x_out = out2[:, :Opad]
    gate = out2[:, Opad:]

    vo_ref[...] = (gate[None, :, :] * vec2).astype(vo_ref.dtype)
    xo_ref[...] = (jax.nn.sigmoid(x_out) * x_out * SILU_SCALE).astype(xo_ref.dtype)


# --------------------------------------------------------------------------
# Hardware-aware helpers
# --------------------------------------------------------------------------
def _device_kind() -> str:
    try:
        return jax.devices()[0].device_kind.lower()
    except Exception:
        return ""


def _physical_vmem_bytes() -> int:
    try:
        return int(pltpu.get_tpu_info().vmem_capacity_bytes)
    except Exception:
        # Conservative fallback: assume a v7x-class part (64 MiB / TensorCore).
        return 64 * 1024 * 1024


def _default_vmem_limit() -> int:
    # ~3/4 of physical VMEM: ~48 MiB on v7x, ~96 MiB on v5e/v6e (both far above
    # v5e's 16 MiB scoped default), capped at 100 MiB.
    return min(_physical_vmem_bytes() * 3 // 4, 100 * 1024 * 1024)


def _auto_compute_dtype(x_dtype):
    kind = _device_kind()
    if any(tag in kind for tag in ("v6", "v7", "7x", "trillium")):
        return jnp.bfloat16     # bf16 MXU inputs; accumulation stays f32 in-kernel
    return x_dtype


def _choose_tn(N, H, Opad, itemsize, vmem_limit_bytes, step, min_grid=2):
    """Largest step-aligned node tile that fits the VMEM budget.

    Prefers a divisor of N; otherwise returns a non-dividing tile (the grid
    then uses cdiv and the last block is padded/masked). Keeps at least
    `min_grid` grid steps when possible so v7x's two TensorCores both get work
    and the pipeline has something to overlap.
    """
    if N <= step:
        return N
    # Weights/biases are single-buffered (pl.Buffered(1), constant index_map).
    weight_bytes = (3 * H * H + 3 * H * Opad) * itemsize + (H + 2 * Opad) * 4
    # Per node: double-buffered streamed tiles (x:H, v:3H, xo:O, vo:3O), f32
    # intermediates (p:3H, vec1:H, pre/h:2H, vec2:3O, out2:2O, gated:3O, ...),
    # plus the v tile materialized as a value in compute dtype.
    per_node = (
        2 * 4 * (H + Opad) * itemsize
        + 4 * (6 * H + 9 * Opad)
        + 3 * H * itemsize
    )
    budget = vmem_limit_bytes - weight_bytes - (2 << 20)   # slack for Mosaic scratch
    cap = max(budget // per_node, step)
    cap = min(cap, 1024)
    if min_grid > 1 and N >= min_grid * step:
        cap = min(cap, max(N // min_grid, step))           # keep >= min_grid grid steps
    cap = max((cap // step) * step, step)

    best = 0
    t = step
    while t <= min(cap, N):
        if N % t == 0:
            best = t
        t += step
    if best == 0:
        # No nice divisor under the budget: use a non-dividing, budget-respecting
        # tile; the cdiv grid masks the last partial block.
        best = max((min(cap, N) // step) * step, step)
    return int(best)


# --------------------------------------------------------------------------
# Wrapper
# --------------------------------------------------------------------------
def gated_equivariant_block(
    x, v, params, *,
    tn=None,
    compute_dtype="auto",
    vmem_limit_bytes=None,
    vectors_spatial_major=False,
):
    """GatedEquivariantBlock forward.

    x: (N, H). v: (N, 3, H)  (or (3, N, H) with vectors_spatial_major=True,
    which also returns the vector output as (3, N, O) and skips both HBM
    transposes). params = (w1, w2, wu1, bu1, wu2, bu2), weights pre-transposed
    to (in_features, out_features). Returns (x_out (N, O), v_out (N, 3, O)).
    """
    N, H = x.shape
    w1, w2, wu1, bu1, wu2, bu2 = params
    O = w2.shape[1]

    if vectors_spatial_major:
        assert v.shape == (3, N, H)
        v_sm = v
    else:
        assert v.shape == (N, 3, H)
        # TODO(synk): adopt (3, N, H) as the persistent model layout to avoid
        # this HBM round trip (and the one on the way out) entirely.
        v_sm = jnp.transpose(v, (1, 0, 2))

    # ---- compute dtype / lane padding / weight prep (one-time per call; hoist
    # out of the hot loop in real use) ----
    if isinstance(compute_dtype, str) and compute_dtype == "auto":
        cdt = _auto_compute_dtype(x.dtype)
    elif compute_dtype is None:
        cdt = x.dtype
    else:
        cdt = compute_dtype
    itemsize = jnp.dtype(cdt).itemsize

    Opad = max(128, ((O + 127) // 128) * 128)
    padO = Opad - O

    # Split update_net[0] so the kernel never concats on the lane axis; fuse +
    # lane-pad update_net[2]; fold ScaledSiLU's 1/0.6 into its weight columns.
    wu1_x, wu1_v = wu1[:H], wu1[H:]
    wu2_x = jnp.pad(wu2[:, :O] * SILU_SCALE, ((0, 0), (0, padO)))
    wu2_g = jnp.pad(wu2[:, O:] * SILU_SCALE, ((0, 0), (0, padO)))
    wu2_f = jnp.concatenate([wu2_x, wu2_g], axis=1)             # (H, 2*Opad)
    bu2_f = jnp.concatenate(
        [jnp.pad(bu2[:, :O], ((0, 0), (0, padO))),
         jnp.pad(bu2[:, O:], ((0, 0), (0, padO)))], axis=1)     # (1, 2*Opad)
    w2_p = jnp.pad(w2, ((0, 0), (0, padO)))                     # (H, Opad)
    # TODO(synk): lane-pad H to a multiple of 128 for very small H as well;
    # that requires padding x and v (extra HBM traffic) so it is left to callers.

    vmem_limit = int(vmem_limit_bytes) if vmem_limit_bytes else _default_vmem_limit()

    step = 8 if itemsize >= 4 else (16 if itemsize == 2 else 32)
    if tn is None:
        tn = _choose_tn(N, H, Opad, itemsize, vmem_limit, step)
    assert tn == N or tn % 8 == 0, f"tn={tn} must be a multiple of 8 (or == N)"
    grid = (pl.cdiv(N, tn),)

    cast = lambda a: a.astype(cdt)
    args = (
        cast(x), cast(v_sm),
        cast(w1), cast(w2_p),
        cast(wu1_x), cast(wu1_v), bu1.astype(jnp.float32),
        cast(wu2_f), bu2_f.astype(jnp.float32),
    )

    out_shapes = (
        jax.ShapeDtypeStruct((N, Opad), x.dtype),
        jax.ShapeDtypeStruct((3, N, Opad), x.dtype),
    )

    def _call(buffered_weights):
        def wspec(shape):
            idx = lambda i: (0,) * len(shape)
            if buffered_weights:
                try:
                    # Constant index_map => weight never re-DMAs; one buffer
                    # halves its VMEM footprint.
                    return pl.BlockSpec(shape, idx, pipeline_mode=pl.Buffered(1))
                except TypeError:
                    pass
            return pl.BlockSpec(shape, idx)

        return pl.pallas_call(
            gated_equivariant_kernel,
            out_shape=out_shapes,
            grid_spec=pltpu.PrefetchScalarGridSpec(
                num_scalar_prefetch=0,
                grid=grid,
                in_specs=[
                    pl.BlockSpec((tn, H), lambda i: (i, 0)),         # x
                    pl.BlockSpec((3, tn, H), lambda i: (0, i, 0)),   # v (spatial-major)
                    wspec((H, H)),             # w1
                    wspec((H, Opad)),          # w2 (padded)
                    wspec((H, H)),             # wu1_x
                    wspec((H, H)),             # wu1_v
                    wspec((1, H)),             # bu1
                    wspec((H, 2 * Opad)),      # wu2 fused (x|gate), pre-scaled
                    wspec((1, 2 * Opad)),      # bu2 fused (x|gate)
                ],
                out_specs=[
                    pl.BlockSpec((tn, Opad), lambda i: (i, 0)),
                    pl.BlockSpec((3, tn, Opad), lambda i: (0, i, 0)),
                ],
            ),
            compiler_params=pltpu.CompilerParams(
                dimension_semantics=("parallel",),
                vmem_limit_bytes=vmem_limit,
            ),
        )(*args)

    try:
        xo, vo = _call(True)
    except Exception:
        # Fallback if this jax build rejects single-buffered pipeline_mode.
        xo, vo = _call(False)

    if padO:
        xo = xo[:, :O]
        vo = vo[:, :, :O]
    if vectors_spatial_major:
        return xo, vo
    return xo, jnp.transpose(vo, (1, 0, 2))


# --------------------------------------------------------------------------
# Params / reference
# --------------------------------------------------------------------------
def _xavier(key, fan_in, fan_out):
    # xavier_uniform_: U(-a, a), a = sqrt(6 / (fan_in + fan_out))
    a = jnp.sqrt(6.0 / (fan_in + fan_out))
    return jax.random.uniform(key, (fan_in, fan_out), jnp.float32, -a, a)


def make_params(key, hidden_channels, out_channels):
    k1, k2, k3, k4 = jax.random.split(key, 4)
    H, O = hidden_channels, out_channels
    w1 = _xavier(k1, H, H)            # vec1_proj.weight^T   (no bias)
    w2 = _xavier(k2, H, O)            # vec2_proj.weight^T   (no bias)
    wu1 = _xavier(k3, 2 * H, H)       # update_net[0].weight^T
    bu1 = jnp.zeros((1, H), jnp.float32)
    wu2 = _xavier(k4, H, 2 * O)       # update_net[2].weight^T
    bu2 = jnp.zeros((1, 2 * O), jnp.float32)
    return (w1, w2, wu1, bu1, wu2, bu2)


def reference(x, v, params):
    w1, w2, wu1, bu1, wu2, bu2 = params
    O = w2.shape[1]
    vec1 = jnp.linalg.norm(jnp.einsum("nsh,hk->nsk", v, w1), axis=-2)
    vec2 = jnp.einsum("nsh,ho->nso", v, w2)
    cat = jnp.concatenate([x, vec1], axis=-1)
    h = _scaled_silu(cat @ wu1 + bu1)
    out = h @ wu2 + bu2
    x_out, v_gate = out[:, :O], out[:, O:]
    v_out = v_gate[:, None, :] * vec2
    return _scaled_silu(x_out), v_out


def _rel_err(a, b):
    return float(jnp.max(jnp.abs(a.astype(jnp.float32) - b))
                 / (jnp.max(jnp.abs(b)) + 1e-6))


if __name__ == "__main__":
    N, H, O = 16, 32, 16
    key = jax.random.PRNGKey(0)
    kx, kv, kp = jax.random.split(key, 3)
    x = jax.random.normal(kx, (N, H), jnp.float32)
    v = jax.random.normal(kv, (N, 3, H), jnp.float32)
    params = make_params(kp, H, O)

    x_ref, v_ref = reference(x, v, params)

    # f32 compute path: tight check vs the reference (tn auto -> 8, grid (2,)).
    x_out, v_out = gated_equivariant_block(x, v, params, compute_dtype=jnp.float32)
    jax.block_until_ready((x_out, v_out))
    assert x_out.shape == (N, O) and v_out.shape == (N, 3, O)
    assert jnp.allclose(x_out, x_ref, atol=1e-4, rtol=1e-4)
    assert jnp.allclose(v_out, v_ref, atol=1e-4, rtol=1e-4)

    # Auto path (bf16 on v6e/v7x, f32 elsewhere): loose sanity check.
    x_a, v_a = gated_equivariant_block(x, v, params)
    jax.block_until_ready((x_a, v_a))
    assert _rel_err(x_a, x_ref) < 0.15
    assert _rel_err(v_a, v_ref) < 0.15

    print("KERNEL_OK")
</pallas_src>

<mosaic_0001>
module attributes {stable_mosaic.version = 11 : i64} {
  func.func @gated_equivariant_kernel(%arg0: i32, %arg1: memref<8x32xf32, #tpu.memory_space<vmem>>, %arg2: memref<3x8x32xf32, #tpu.memory_space<vmem>>, %arg3: memref<32x32xf32, #tpu.memory_space<vmem>>, %arg4: memref<32x128xf32, #tpu.memory_space<vmem>>, %arg5: memref<32x32xf32, #tpu.memory_space<vmem>>, %arg6: memref<32x32xf32, #tpu.memory_space<vmem>>, %arg7: memref<1x32xf32, #tpu.memory_space<vmem>>, %arg8: memref<32x256xf32, #tpu.memory_space<vmem>>, %arg9: memref<1x256xf32, #tpu.memory_space<vmem>>, %arg10: memref<8x128xf32, #tpu.memory_space<vmem>>, %arg11: memref<3x8x128xf32, #tpu.memory_space<vmem>>) attributes {dimension_semantics = [#tpu.dimension_semantics<parallel>], iteration_bounds = array<i64: 2>, scalar_prefetch = 0 : i64, scratch_operands = 0 : i64, tpu.core_type = #tpu.core_type<tc>, window_params = [{transform_indices = @transform_0, window_bounds = array<i64: 8, 32>}, {transform_indices = @transform_1, window_bounds = array<i64: 3, 8, 32>}, {pipeline_mode = #tpu.pipeline_mode<synchronous>, transform_indices = @transform_2, window_bounds = array<i64: 32, 32>}, {pipeline_mode = #tpu.pipeline_mode<synchronous>, transform_indices = @transform_3, window_bounds = array<i64: 32, 128>}, {pipeline_mode = #tpu.pipeline_mode<synchronous>, transform_indices = @transform_4, window_bounds = array<i64: 32, 32>}, {pipeline_mode = #tpu.pipeline_mode<synchronous>, transform_indices = @transform_5, window_bounds = array<i64: 32, 32>}, {pipeline_mode = #tpu.pipeline_mode<synchronous>, transform_indices = @transform_6, window_bounds = array<i64: 1, 32>}, {pipeline_mode = #tpu.pipeline_mode<synchronous>, transform_indices = @transform_7, window_bounds = array<i64: 32, 256>}, {pipeline_mode = #tpu.pipeline_mode<synchronous>, transform_indices = @transform_8, window_bounds = array<i64: 1, 256>}, {transform_indices = @transform_9, window_bounds = array<i64: 8, 128>}, {transform_indices = @transform_10, window_bounds = array<i64: 3, 8, 128>}]} {
    %c0 = arith.constant 0 : index
    %c0_0 = arith.constant 0 : index
    %c0_1 = arith.constant 0 : index
    %0 = vector.load %arg2[%c0, %c0_0, %c0_1] : memref<3x8x32xf32, #tpu.memory_space<vmem>>, vector<3x8x32xf32>
    %1 = vector.shape_cast %0 : vector<3x8x32xf32> to vector<24x32xf32>
    %c0_2 = arith.constant 0 : index
    %c0_3 = arith.constant 0 : index
    %2 = vector.load %arg3[%c0_2, %c0_3] : memref<32x32xf32, #tpu.memory_space<vmem>>, vector<32x32xf32>
    %cst = arith.constant dense<0.000000e+00> : vector<24x32xf32>
    %3 = tpu.matmul %1, %2, %cst {dimension_numbers = #tpu.dot_dimension_numbers<[1], [0], [0], [1], [0, 0, 1, 1], [], []>} : vector<24x32xf32>, vector<32x32xf32>, vector<24x32xf32> -> vector<24x32xf32>
    %4 = vector.shape_cast %3 : vector<24x32xf32> to vector<3x8x32xf32>
    %5 = arith.mulf %4, %4 : vector<3x8x32xf32>
    %6 = vector.extract_strided_slice %5 {offsets = [0, 0, 0], sizes = [1, 8, 32], strides = [1, 1, 1]} : vector<3x8x32xf32> to vector<1x8x32xf32>
    %7 = vector.shape_cast %6 : vector<1x8x32xf32> to vector<8x32xf32>
    %8 = vector.extract_strided_slice %5 {offsets = [1, 0, 0], sizes = [1, 8, 32], strides = [1, 1, 1]} : vector<3x8x32xf32> to vector<1x8x32xf32>
    %9 = vector.shape_cast %8 : vector<1x8x32xf32> to vector<8x32xf32>
    %10 = arith.addf %7, %9 : vector<8x32xf32>
    %11 = vector.extract_strided_slice %5 {offsets = [2, 0, 0], sizes = [1, 8, 32], strides = [1, 1, 1]} : vector<3x8x32xf32> to vector<1x8x32xf32>
    %12 = vector.shape_cast %11 : vector<1x8x32xf32> to vector<8x32xf32>
    %13 = arith.addf %10, %12 : vector<8x32xf32>
    %14 = math.sqrt %13 : vector<8x32xf32>
    %c0_4 = arith.constant 0 : index
    %c0_5 = arith.constant 0 : index
    %15 = vector.load %arg4[%c0_4, %c0_5] : memref<32x128xf32, #tpu.memory_space<vmem>>, vector<32x128xf32>
    %cst_6 = arith.constant dense<0.000000e+00> : vector<24x128xf32>
    %16 = tpu.matmul %1, %15, %cst_6 {dimension_numbers = #tpu.dot_dimension_numbers<[1], [0], [0], [1], [0, 0, 1, 1], [], []>} : vector<24x32xf32>, vector<32x128xf32>, vector<24x128xf32> -> vector<24x128xf32>
    %17 = vector.shape_cast %16 : vector<24x128xf32> to vector<3x8x128xf32>
    %c0_7 = arith.constant 0 : index
    %c0_8 = arith.constant 0 : index
    %18 = vector.load %arg1[%c0_7, %c0_8] : memref<8x32xf32, #tpu.memory_space<vmem>>, vector<8x32xf32>
    %c0_9 = arith.constant 0 : index
    %c0_10 = arith.constant 0 : index
    %19 = vector.load %arg5[%c0_9, %c0_10] : memref<32x32xf32, #tpu.memory_space<vmem>>, vector<32x32xf32>
    %cst_11 = arith.constant dense<0.000000e+00> : vector<8x32xf32>
    %20 = tpu.matmul %18, %19, %cst_11 {dimension_numbers = #tpu.dot_dimension_numbers<[1], [0], [0], [1], [0, 0, 1, 1], [], []>} : vector<8x32xf32>, vector<32x32xf32>, vector<8x32xf32> -> vector<8x32xf32>
    %c0_12 = arith.constant 0 : index
    %c0_13 = arith.constant 0 : index
    %21 = vector.load %arg6[%c0_12, %c0_13] : memref<32x32xf32, #tpu.memory_space<vmem>>, vector<32x32xf32>
    %cst_14 = arith.constant dense<0.000000e+00> : vector<8x32xf32>
    %22 = tpu.matmul %14, %21, %cst_14 {dimension_numbers = #tpu.dot_dimension_numbers<[1], [0], [0], [1], [0, 0, 1, 1], [], []>} : vector<8x32xf32>, vector<32x32xf32>, vector<8x32xf32> -> vector<8x32xf32>
    %23 = arith.addf %20, %22 : vector<8x32xf32>
    %c0_15 = arith.constant 0 : index
    %c0_16 = arith.constant 0 : index
    %24 = vector.load %arg7[%c0_15, %c0_16] : memref<1x32xf32, #tpu.memory_space<vmem>>, vector<1x32xf32>
    %25 = vector.broadcast %24 : vector<1x32xf32> to vector<8x32xf32>
    %26 = arith.addf %23, %25 : vector<8x32xf32>
    %27 = arith.negf %26 : vector<8x32xf32>
    %28 = math.exp %27 : vector<8x32xf32>
    %cst_17 = arith.constant 1.000000e+00 : f32
    %29 = vector.broadcast %cst_17 : f32 to vector<8x32xf32>
    %30 = arith.addf %29, %28 : vector<8x32xf32>
    %31 = arith.divf %29, %30 : vector<8x32xf32>
    %32 = arith.mulf %31, %26 : vector<8x32xf32>
    %c0_18 = arith.constant 0 : index
    %c0_19 = arith.constant 0 : index
    %33 = vector.load %arg8[%c0_18, %c0_19] : memref<32x256xf32, #tpu.memory_space<vmem>>, vector<32x256xf32>
    %cst_20 = arith.constant dense<0.000000e+00> : vector<8x256xf32>
    %34 = tpu.matmul %32, %33, %cst_20 {dimension_numbers = #tpu.dot_dimension_numbers<[1], [0], [0], [1], [0, 0, 1, 1], [], []>} : vector<8x32xf32>, vector<32x256xf32>, vector<8x256xf32> -> vector<8x256xf32>
    %c0_21 = arith.constant 0 : index
    %c0_22 = arith.constant 0 : index
    %35 = vector.load %arg9[%c0_21, %c0_22] : memref<1x256xf32, #tpu.memory_space<vmem>>, vector<1x256xf32>
    %36 = vector.broadcast %35 : vector<1x256xf32> to vector<8x256xf32>
    %37 = arith.addf %34, %36 : vector<8x256xf32>
    %38 = vector.extract_strided_slice %37 {offsets = [0, 0], sizes = [8, 128], strides = [1, 1]} : vector<8x256xf32> to vector<8x128xf32>
    %39 = vector.extract_strided_slice %37 {offsets = [0, 128], sizes = [8, 128], strides = [1, 1]} : vector<8x256xf32> to vector<8x128xf32>
    %40 = vector.shape_cast %39 : vector<8x128xf32> to vector<1x8x128xf32>
    %41 = vector.broadcast %40 : vector<1x8x128xf32> to vector<3x8x128xf32>
    %42 = arith.mulf %41, %17 : vector<3x8x128xf32>
    %c0_23 = arith.constant 0 : index
    %c0_24 = arith.constant 0 : index
    %c0_25 = arith.constant 0 : index
    %43 = vector.load %arg11[%c0_23, %c0_24, %c0_25] : memref<3x8x128xf32, #tpu.memory_space<vmem>>, vector<3x8x128xf32>
    tpu.vector_store %arg11[%c0_23, %c0_24, %c0_25], %42 {strides = array<i32>} : memref<3x8x128xf32, #tpu.memory_space<vmem>>, vector<3x8x128xf32>,
    %44 = arith.negf %38 : vector<8x128xf32>
    %45 = math.exp %44 : vector<8x128xf32>
    %cst_26 = arith.constant 1.000000e+00 : f32
    %46 = vector.broadcast %cst_26 : f32 to vector<8x128xf32>
    %47 = arith.addf %46, %45 : vector<8x128xf32>
    %48 = arith.divf %46, %47 : vector<8x128xf32>
    %49 = arith.mulf %48, %38 : vector<8x128xf32>
    %cst_27 = arith.constant 1.66666663 : f32
    %50 = vector.broadcast %cst_27 : f32 to vector<8x128xf32>
    %51 = arith.mulf %49, %50 : vector<8x128xf32>
    %c0_28 = arith.constant 0 : index
    %c0_29 = arith.constant 0 : index
    %52 = vector.load %arg10[%c0_28, %c0_29] : memref<8x128xf32, #tpu.memory_space<vmem>>, vector<8x128xf32>
    tpu.vector_store %arg10[%c0_28, %c0_29], %51 {strides = array<i32>} : memref<8x128xf32, #tpu.memory_space<vmem>>, vector<8x128xf32>,
    return
  }
  func.func @transform_0(%arg0: i32) -> (i32, i32) {
    %c0_i32 = arith.constant 0 : i32
    %c0_i32_0 = arith.constant 0 : i32
    return %arg0, %c0_i32 : i32, i32
  }
  func.func @transform_1(%arg0: i32) -> (i32, i32, i32) {
    %c0_i32 = arith.constant 0 : i32
    %c0_i32_0 = arith.constant 0 : i32
    %c0_i32_1 = arith.constant 0 : i32
    return %c0_i32, %arg0, %c0_i32_0 : i32, i32, i32
  }
  func.func @transform_2(%arg0: i32) -> (i32, i32) {
    %c0_i32 = arith.constant 0 : i32
    %c0_i32_0 = arith.constant 0 : i32
    %c0_i32_1 = arith.constant 0 : i32
    return %c0_i32, %c0_i32_0 : i32, i32
  }
  func.func @transform_3(%arg0: i32) -> (i32, i32) {
    %c0_i32 = arith.constant 0 : i32
    %c0_i32_0 = arith.constant 0 : i32
    %c0_i32_1 = arith.constant 0 : i32
    return %c0_i32, %c0_i32_0 : i32, i32
  }
  func.func @transform_4(%arg0: i32) -> (i32, i32) {
    %c0_i32 = arith.constant 0 : i32
    %c0_i32_0 = arith.constant 0 : i32
    %c0_i32_1 = arith.constant 0 : i32
    return %c0_i32, %c0_i32_0 : i32, i32
  }
  func.func @transform_5(%arg0: i32) -> (i32, i32) {
    %c0_i32 = arith.constant 0 : i32
    %c0_i32_0 = arith.constant 0 : i32
    %c0_i32_1 = arith.constant 0 : i32
    return %c0_i32, %c0_i32_0 : i32, i32
  }
  func.func @transform_6(%arg0: i32) -> (i32, i32) {
    %c0_i32 = arith.constant 0 : i32
    %c0_i32_0 = arith.constant 0 : i32
    %c0_i32_1 = arith.constant 0 : i32
    return %c0_i32, %c0_i32_0 : i32, i32
  }
  func.func @transform_7(%arg0: i32) -> (i32, i32) {
    %c0_i32 = arith.constant 0 : i32
    %c0_i32_0 = arith.constant 0 : i32
    %c0_i32_1 = arith.constant 0 : i32
    return %c0_i32, %c0_i32_0 : i32, i32
  }
  func.func @transform_8(%arg0: i32) -> (i32, i32) {
    %c0_i32 = arith.constant 0 : i32
    %c0_i32_0 = arith.constant 0 : i32
    %c0_i32_1 = arith.constant 0 : i32
    return %c0_i32, %c0_i32_0 : i32, i32
  }
  func.func @transform_9(%arg0: i32) -> (i32, i32) {
    %c0_i32 = arith.constant 0 : i32
    %c0_i32_0 = arith.constant 0 : i32
    return %arg0, %c0_i32 : i32, i32
  }
  func.func @transform_10(%arg0: i32) -> (i32, i32, i32) {
    %c0_i32 = arith.constant 0 : i32
    %c0_i32_0 = arith.constant 0 : i32
    %c0_i32_1 = arith.constant 0 : i32
    return %c0_i32, %arg0, %c0_i32_0 : i32, i32, i32
  }
}

module attributes {stable_mosaic.version = 11 : i64} {
  func.func @gated_equivariant_kernel(%arg0: i32, %arg1: memref<8x32xf32, #tpu.memory_space<vmem>>, %arg2: memref<3x8x32xf32, #tpu.memory_space<vmem>>, %arg3: memref<32x32xf32, #tpu.memory_space<vmem>>, %arg4: memref<32x128xf32, #tpu.memory_space<vmem>>, %arg5: memref<32x32xf32, #tpu.memory_space<vmem>>, %arg6: memref<32x32xf32, #tpu.memory_space<vmem>>, %arg7: memref<1x32xf32, #tpu.memory_space<vmem>>, %arg8: memref<32x256xf32, #tpu.memory_space<vmem>>, %arg9: memref<1x256xf32, #tpu.memory_space<vmem>>, %arg10: memref<8x128xf32, #tpu.memory_space<vmem>>, %arg11: memref<3x8x128xf32, #tpu.memory_space<vmem>>) attributes {dimension_semantics = [#tpu.dimension_semantics<parallel>], iteration_bounds = array<i64: 2>, scalar_prefetch = 0 : i64, scratch_operands = 0 : i64, tpu.core_type = #tpu.core_type<tc>, window_params = [{transform_indices = @transform_0, window_bounds = array<i64: 8, 32>}, {transform_indices = @transform_1, window_bounds = array<i64: 3, 8, 32>}, {pipeline_mode = #tpu.pipeline_mode<synchronous>, transform_indices = @transform_2, window_bounds = array<i64: 32, 32>}, {pipeline_mode = #tpu.pipeline_mode<synchronous>, transform_indices = @transform_3, window_bounds = array<i64: 32, 128>}, {pipeline_mode = #tpu.pipeline_mode<synchronous>, transform_indices = @transform_4, window_bounds = array<i64: 32, 32>}, {pipeline_mode = #tpu.pipeline_mode<synchronous>, transform_indices = @transform_5, window_bounds = array<i64: 32, 32>}, {pipeline_mode = #tpu.pipeline_mode<synchronous>, transform_indices = @transform_6, window_bounds = array<i64: 1, 32>}, {pipeline_mode = #tpu.pipeline_mode<synchronous>, transform_indices = @transform_7, window_bounds = array<i64: 32, 256>}, {pipeline_mode = #tpu.pipeline_mode<synchronous>, transform_indices = @transform_8, window_bounds = array<i64: 1, 256>}, {transform_indices = @transform_9, window_bounds = array<i64: 8, 128>}, {transform_indices = @transform_10, window_bounds = array<i64: 3, 8, 128>}]} {
    %c0 = arith.constant 0 : index
    %c0_0 = arith.constant 0 : index
    %c0_1 = arith.constant 0 : index
    %0 = vector.load %arg2[%c0, %c0_0, %c0_1] : memref<3x8x32xf32, #tpu.memory_space<vmem>>, vector<3x8x32xf32>
    %1 = vector.shape_cast %0 : vector<3x8x32xf32> to vector<24x32xf32>
    %c0_2 = arith.constant 0 : index
    %c0_3 = arith.constant 0 : index
    %2 = vector.load %arg3[%c0_2, %c0_3] : memref<32x32xf32, #tpu.memory_space<vmem>>, vector<32x32xf32>
    %cst = arith.constant dense<0.000000e+00> : vector<24x32xf32>
    %3 = tpu.matmul %1, %2, %cst {dimension_numbers = #tpu.dot_dimension_numbers<[1], [0], [0], [1], [0, 0, 1, 1], [], []>} : vector<24x32xf32>, vector<32x32xf32>, vector<24x32xf32> -> vector<24x32xf32>
    %4 = vector.shape_cast %3 : vector<24x32xf32> to vector<3x8x32xf32>
    %5 = arith.mulf %4, %4 : vector<3x8x32xf32>
    %6 = vector.extract_strided_slice %5 {offsets = [0, 0, 0], sizes = [1, 8, 32], strides = [1, 1, 1]} : vector<3x8x32xf32> to vector<1x8x32xf32>
    %7 = vector.shape_cast %6 : vector<1x8x32xf32> to vector<8x32xf32>
    %8 = vector.extract_strided_slice %5 {offsets = [1, 0, 0], sizes = [1, 8, 32], strides = [1, 1, 1]} : vector<3x8x32xf32> to vector<1x8x32xf32>
    %9 = vector.shape_cast %8 : vector<1x8x32xf32> to vector<8x32xf32>
    %10 = arith.addf %7, %9 : vector<8x32xf32>
    %11 = vector.extract_strided_slice %5 {offsets = [2, 0, 0], sizes = [1, 8, 32], strides = [1, 1, 1]} : vector<3x8x32xf32> to vector<1x8x32xf32>
    %12 = vector.shape_cast %11 : vector<1x8x32xf32> to vector<8x32xf32>
    %13 = arith.addf %10, %12 : vector<8x32xf32>
    %14 = math.sqrt %13 : vector<8x32xf32>
    %c0_4 = arith.constant 0 : index
    %c0_5 = arith.constant 0 : index
    %15 = vector.load %arg4[%c0_4, %c0_5] : memref<32x128xf32, #tpu.memory_space<vmem>>, vector<32x128xf32>
    %cst_6 = arith.constant dense<0.000000e+00> : vector<24x128xf32>
    %16 = tpu.matmul %1, %15, %cst_6 {dimension_numbers = #tpu.dot_dimension_numbers<[1], [0], [0], [1], [0, 0, 1, 1], [], []>} : vector<24x32xf32>, vector<32x128xf32>, vector<24x128xf32> -> vector<24x128xf32>
    %17 = vector.shape_cast %16 : vector<24x128xf32> to vector<3x8x128xf32>
    %c0_7 = arith.constant 0 : index
    %c0_8 = arith.constant 0 : index
    %18 = vector.load %arg1[%c0_7, %c0_8] : memref<8x32xf32, #tpu.memory_space<vmem>>, vector<8x32xf32>
    %c0_9 = arith.constant 0 : index
    %c0_10 = arith.constant 0 : index
    %19 = vector.load %arg5[%c0_9, %c0_10] : memref<32x32xf32, #tpu.memory_space<vmem>>, vector<32x32xf32>
    %cst_11 = arith.constant dense<0.000000e+00> : vector<8x32xf32>
    %20 = tpu.matmul %18, %19, %cst_11 {dimension_numbers = #tpu.dot_dimension_numbers<[1], [0], [0], [1], [0, 0, 1, 1], [], []>} : vector<8x32xf32>, vector<32x32xf32>, vector<8x32xf32> -> vector<8x32xf32>
    %c0_12 = arith.constant 0 : index
    %c0_13 = arith.constant 0 : index
    %21 = vector.load %arg6[%c0_12, %c0_13] : memref<32x32xf32, #tpu.memory_space<vmem>>, vector<32x32xf32>
    %cst_14 = arith.constant dense<0.000000e+00> : vector<8x32xf32>
    %22 = tpu.matmul %14, %21, %cst_14 {dimension_numbers = #tpu.dot_dimension_numbers<[1], [0], [0], [1], [0, 0, 1, 1], [], []>} : vector<8x32xf32>, vector<32x32xf32>, vector<8x32xf32> -> vector<8x32xf32>
    %23 = arith.addf %20, %22 : vector<8x32xf32>
    %c0_15 = arith.constant 0 : index
    %c0_16 = arith.constant 0 : index
    %24 = vector.load %arg7[%c0_15, %c0_16] : memref<1x32xf32, #tpu.memory_space<vmem>>, vector<1x32xf32>
    %25 = vector.broadcast %24 : vector<1x32xf32> to vector<8x32xf32>
    %26 = arith.addf %23, %25 : vector<8x32xf32>
    %27 = arith.negf %26 : vector<8x32xf32>
    %28 = math.exp %27 : vector<8x32xf32>
    %cst_17 = arith.constant 1.000000e+00 : f32
    %29 = vector.broadcast %cst_17 : f32 to vector<8x32xf32>
    %30 = arith.addf %29, %28 : vector<8x32xf32>
    %31 = arith.divf %29, %30 : vector<8x32xf32>
    %32 = arith.mulf %31, %26 : vector<8x32xf32>
    %c0_18 = arith.constant 0 : index
    %c0_19 = arith.constant 0 : index
    %33 = vector.load %arg8[%c0_18, %c0_19] : memref<32x256xf32, #tpu.memory_space<vmem>>, vector<32x256xf32>
    %cst_20 = arith.constant dense<0.000000e+00> : vector<8x256xf32>
    %34 = tpu.matmul %32, %33, %cst_20 {dimension_numbers = #tpu.dot_dimension_numbers<[1], [0], [0], [1], [0, 0, 1, 1], [], []>} : vector<8x32xf32>, vector<32x256xf32>, vector<8x256xf32> -> vector<8x256xf32>
    %c0_21 = arith.constant 0 : index
    %c0_22 = arith.constant 0 : index
    %35 = vector.load %arg9[%c0_21, %c0_22] : memref<1x256xf32, #tpu.memory_space<vmem>>, vector<1x256xf32>
    %36 = vector.broadcast %35 : vector<1x256xf32> to vector<8x256xf32>
    %37 = arith.addf %34, %36 : vector<8x256xf32>
    %38 = vector.extract_strided_slice %37 {offsets = [0, 0], sizes = [8, 128], strides = [1, 1]} : vector<8x256xf32> to vector<8x128xf32>
    %39 = vector.extract_strided_slice %37 {offsets = [0, 128], sizes = [8, 128], strides = [1, 1]} : vector<8x256xf32> to vector<8x128xf32>
    %40 = vector.shape_cast %39 : vector<8x128xf32> to vector<1x8x128xf32>
    %41 = vector.broadcast %40 : vector<1x8x128xf32> to vector<3x8x128xf32>
    %42 = arith.mulf %41, %17 : vector<3x8x128xf32>
    %c0_23 = arith.constant 0 : index
    %c0_24 = arith.constant 0 : index
    %c0_25 = arith.constant 0 : index
    %43 = vector.load %arg11[%c0_23, %c0_24, %c0_25] : memref<3x8x128xf32, #tpu.memory_space<vmem>>, vector<3x8x128xf32>
    tpu.vector_store %arg11[%c0_23, %c0_24, %c0_25], %42 {strides = array<i32>} : memref<3x8x128xf32, #tpu.memory_space<vmem>>, vector<3x8x128xf32>,
    %44 = arith.negf %38 : vector<8x128xf32>
    %45 = math.exp %44 : vector<8x128xf32>
    %cst_26 = arith.constant 1.000000e+00 : f32
    %46 = vector.broadcast %cst_26 : f32 to vector<8x128xf32>
    %47 = arith.addf %46, %45 : vector<8x128xf32>
    %48 = arith.divf %46, %47 : vector<8x128xf32>
    %49 = arith.mulf %48, %38 : vector<8x128xf32>
    %cst_27 = arith.constant 1.66666663 : f32
    %50 = vector.broadcast %cst_27 : f32 to vector<8x128xf32>
    %51 = arith.mulf %49, %50 : vector<8x128xf32>
    %c0_28 = arith.constant 0 : index
    %c0_29 = arith.constant 0 : index
    %52 = vector.load %arg10[%c0_28, %c0_29] : memref<8x128xf32, #tpu.memory_space<vmem>>, vector<8x128xf32>
    tpu.vector_store %arg10[%c0_28, %c0_29], %51 {strides = array<i32>} : memref<8x128xf32, #tpu.memory_space<vmem>>, vector<8x128xf32>,
    return
  }
  func.func @transform_0(%arg0: i32) -> (i32, i32) {
    %c0_i32 = arith.constant 0 : i32
    %c0_i32_0 = arith.constant 0 : i32
    return %arg0, %c0_i32 : i32, i32
  }
  func.func @transform_1(%arg0: i32) -> (i32, i32, i32) {
    %c0_i32 = arith.constant 0 : i32
    %c0_i32_0 = arith.constant 0 : i32
    %c0_i32_1 = arith.constant 0 : i32
    return %c0_i32, %arg0, %c0_i32_0 : i32, i32, i32
  }
  func.func @transform_2(%arg0: i32) -> (i32, i32) {
    %c0_i32 = arith.constant 0 : i32
    %c0_i32_0 = arith.constant 0 : i32
    %c0_i32_1 = arith.constant 0 : i32
    return %c0_i32, %c0_i32_0 : i32, i32
  }
  func.func @transform_3(%arg0: i32) -> (i32, i32) {
    %c0_i32 = arith.constant 0 : i32
    %c0_i32_0 = arith.constant 0 : i32
    %c0_i32_1 = arith.constant 0 : i32
    return %c0_i32, %c0_i32_0 : i32, i32
  }
  func.func @transform_4(%arg0: i32) -> (i32, i32) {
    %c0_i32 = arith.constant 0 : i32
    %c0_i32_0 = arith.constant 0 : i32
    %c0_i32_1 = arith.constant 0 : i32
    return %c0_i32, %c0_i32_0 : i32, i32
  }
  func.func @transform_5(%arg0: i32) -> (i32, i32) {
    %c0_i32 = arith.constant 0 : i32
    %c0_i32_0 = arith.constant 0 : i32
    %c0_i32_1 = arith.constant 0 : i32
    return %c0_i32, %c0_i32_0 : i32, i32
  }
  func.func @transform_6(%arg0: i32) -> (i32, i32) {
    %c0_i32 = arith.constant 0 : i32
    %c0_i32_0 = arith.constant 0 : i32
    %c0_i32_1 = arith.constant 0 : i32
    return %c0_i32, %c0_i32_0 : i32, i32
  }
  func.func @transform_7(%arg0: i32) -> (i32, i32) {
    %c0_i32 = arith.constant 0 : i32
    %c0_i32_0 = arith.constant 0 : i32
    %c0_i32_1 = arith.constant 0 : i32
    return %c0_i32, %c0_i32_0 : i32, i32
  }
  func.func @transform_8(%arg0: i32) -> (i32, i32) {
    %c0_i32 = arith.constant 0 : i32
    %c0_i32_0 = arith.constant 0 : i32
    %c0_i32_1 = arith.constant 0 : i32
    return %c0_i32, %c0_i32_0 : i32, i32
  }
  func.func @transform_9(%arg0: i32) -> (i32, i32) {
    %c0_i32 = arith.constant 0 : i32
    %c0_i32_0 = arith.constant 0 : i32
    return %arg0, %c0_i32 : i32, i32
  }
  func.func @transform_10(%arg0: i32) -> (i32, i32, i32) {
    %c0_i32 = arith.constant 0 : i32
    %c0_i32_0 = arith.constant 0 : i32
    %c0_i32_1 = arith.constant 0 : i32
    return %c0_i32, %arg0, %c0_i32_0 : i32, i32, i32
  }
}

</mosaic_0001>

<bundles_post_ra>
// kernel: tpu_custom_call.1
= control target key start
LH: loop header
LB: loop body
LE: loop exit
PB: predicated region body
PF: predicated region fallthrough
CT: control target
= control target key end

     0   :  { %s2285_s0 = inlined_call_operand.hbm [shape: f32[16,32], index: 0, kind: input, shape index: {}]   ;;  %s2286_s1 = inlined_call_operand.hbm [shape: f32[3,16,32], index: 1, kind: input, shape index: {}]   ;;  %s2287_s2 = inlined_call_operand.hbm [shape: f32[32,32], index: 2, kind: input, shape index: {}]   ;;  %s2288_s3 = inlined_call_operand.hbm [shape: f32[32,128], index: 3, kind: input, shape index: {}]   ;;  %s2289_s4 = inlined_call_operand.hbm [shape: f32[32,32], index: 4, kind: input, shape index: {}]   ;;  %s2290_s5 = inlined_call_operand.hbm [shape: f32[32,32], index: 5, kind: input, shape index: {}]   ;;  %s2291_s6 = inlined_call_operand.vmem [shape: f32[1,32], index: 6, kind: input, shape index: {}]   ;;  %s2292_s7 = inlined_call_operand.hbm [shape: f32[32,256], index: 7, kind: input, shape index: {}]   ;;  %s2293_s8 = inlined_call_operand.vmem [shape: f32[1,256], index: 8, kind: input, shape index: {}]   ;;  %s2294_s9 = inlined_call_operand.hbm [shape: f32[16,128], index: 9, kind: output, shape index: {0}]   ;;  %s2295_s10 = inlined_call_operand.hbm [shape: f32[3,16,128], index: 10, kind: output, shape index: {1}]  }
   0x1   :  { %2304 = sst [smem:[#allocation24_spill]] %s2285_s0 }
   0x2   :  { %2305 = sst [smem:[#allocation25_spill]] %s2287_s2 }
   0x3   :  { %2306 = sst [smem:[#allocation26_spill]] %s2288_s3 }
   0x4   :  { %2307 = sst [smem:[#allocation27_spill]] %s2289_s4 }
   0x5   :  { %2308 = sst [smem:[#allocation28_spill]] %s2290_s5 }
   0x6   :  { %2309 = sst [smem:[#allocation29_spill]] %s2294_s9 }
   0x7   :  { %2310 = sst [smem:[#allocation30_spill]] %s2295_s10 }
   0x8   :  { %16 = vsyncpa [#allocation3], 0 }
   0x9   :  { %18 = vsyncpa [#allocation3 + $0x1], 0 }
   0xa   :  { %19 = vsyncpa [#allocation6], 0 }
   0xb   :  { %21 = vsyncpa [#allocation6 + $0x1], 0 }
   0xc   :  { %22 = vsyncpa [#allocation9], 0 }
   0xd   :  { %23 = vsyncpa [#allocation12], 0 }
   0xe   :  { %24 = vsyncpa [#allocation4], 0 }
   0xf   :  { %26 = vsyncpa [#allocation4 + $0x1], 0 }
  0x10   :  { %27 = vsyncpa [#allocation16], 0 }
  0x11   :  { %29 = vsyncpa [#allocation16 + $0x1], 0  ;;  %s1842_s13 = smov 0   ;;  %s1844_s14 = smov 0  }
  0x12   :  { %s1846_s15 = smov 0   ;;  %s1848_s16 = smov 0  }
  0x13 LB: > { %s1768_s17 = smov [#allocation7]   ;;  %s1863_s19 = sadd.s32 4294967295, %s1766_s16   ;;  %s1766_s16 = sphi %s1848_s16, %s2343_s16   ;;  %s1762_s15 = sphi %s1846_s15, %s2342_s15   ;;  %s1758_s14 = sphi %s1844_s14, %s2341_s14   ;;  %s1754_s13 = sphi %s1842_s13, %s2340_s13  }
  0x14   : > { %s303_s18 = sshll.u32 %s1768_s17, 4  ;;  %p1176_p0 = scmp.ge.s32.totalorder %s1766_s16, 1  ;;  %s1868_s18 = int_to_ptr.vmem [resolvable:$true] %s303_s18 }
  0x15   : > { %p2298_p1 = scmp.eq.s32.totalorder %s1863_s19, 0  ;;  %p291_p2 = scmp.lt.s32.totalorder %s1766_s16, 3 }
  0x16   : > { %s1769_s21 = smov [#allocation8]   ;;  %s1770_s24 = smov [#allocation11]  }
  0x17   : > { %p1870_p3 = pnand %p1176_p0, %p291_p2  ;;  %s316_s22 = sshll.u32 %s1769_s21, 4  ;;  %s1883_s22 = int_to_ptr.vmem [resolvable:$true] %s316_s22 }
  0x18   : > { %s342_s25 = sshll.u32 %s1770_s24, 4  ;;  %s2313_s2 = sld [smem:[#allocation25_spill]]  ;;  %s1885_s25 = int_to_ptr.vmem [resolvable:$true] %s342_s25 }
  0x19   : > { %s2311_s20 = scalar_select %p1870_p3, 1, 0 }
  0x1a   : > { %p1353_p5 = pneg %p1870_p3 }
  0x1c   : > { %p1879_p6 = pnand %p1353_p5, %p2298_p1 }
  0x1e   : > { %s1452_s28 = scalar_lea.hbm %s2313_s2, 512  ;;  %p1895_p8 = pneg %p1879_p6 }
  0x1f   : > { %p1453_p7 = scmp.ne.s32.totalorder %s2313_s2, %s1452_s28  ;;  %p1459_p11 = scmp.lt.u32.totalorder %s1452_s28, %s2313_s2 }
  0x21   : > { %p1455_p9 = pnand %p1895_p8, %p1453_p7 }
  0x23   : > { %p1456_p10 = pneg %p1455_p9 }
  0x25   : > { %p1461_p12 = pnand %p1459_p11, %p1456_p10 }
  0x27   : > { %1464 = shalt.err (!%p1461_p12)
}
  0x28   : > { %s1465_s21 = scalar_lea.vmem %s1868_s18, 512  ;;  %p1473_p5 = scmp.lt.s32.totalorder %s1868_s18, %s1868_s18 }
  0x29   : > { %p1466_p13 = scmp.ne.s32.totalorder %s1868_s18, %s1465_s21  ;;  %p1474_p4 = scmp.lt.s32.totalorder %s1465_s21, %s1465_s21 }
  0x2b   : > { %p1468_p0 = pnand %p1466_p13, %p1895_p8  ;;  %p1475_p7 = por %p1474_p4, %p1473_p5 }
  0x2d   : > { %p1469_p2 = pneg %p1468_p0 }
  0x2f   : > { %p1476_p9 = pnand %p1475_p7, %p1469_p2 }
  0x31   : > { %1479 = shalt.err (!%p1476_p9)
}
  0x32   : > { %s2301_s24 = smov 128   ;;  %s2302_s26 = smov 8  }
  0x33   : > { %1356 = dma.hbm_to_vmem [thread:$0]  (!%p1879_p6), %s2313_s2, 512, %s1868_s18, [#allocation6], %s2301_s24, %s2301_s24, %s2302_s26  }
  0x34   : > { %s2315_s3 = sld [smem:[#allocation26_spill]] }
  0x3a   : > { %s1480_s12 = scalar_lea.hbm %s2315_s3, 512 }
  0x3b   : > { %p1481_p4 = scmp.ne.s32.totalorder %s2315_s3, %s1480_s12  ;;  %p1487_p12 = scmp.lt.u32.totalorder %s1480_s12, %s2315_s3 }
  0x3d   : > { %p1483_p10 = pnand %p1481_p4, %p1895_p8 }
  0x3f   : > { %p1484_p11 = pneg %p1483_p10 }
  0x41   : > { %p1489_p13 = pnand %p1487_p12, %p1484_p11 }
  0x43   : > { %1492 = shalt.err (!%p1489_p13)
}
  0x44   : > { %s1493_s18 = scalar_lea.vmem %s1883_s22, 512  ;;  %p1501_p7 = scmp.lt.s32.totalorder %s1883_s22, %s1883_s22 }
  0x45   : > { %p1494_p0 = scmp.ne.s32.totalorder %s1883_s22, %s1493_s18  ;;  %p1502_p9 = scmp.lt.s32.totalorder %s1493_s18, %s1493_s18 }
  0x47   : > { %p1496_p2 = pnand %p1494_p0, %p1895_p8  ;;  %p1503_p4 = por %p1502_p9, %p1501_p7 }
  0x49   : > { %p1497_p5 = pneg %p1496_p2 }
  0x4b   : > { %p1504_p10 = pnand %p1503_p4, %p1497_p5 }
  0x4d   : > { %1507 = shalt.err (!%p1504_p10)
}
  0x4e   : > { %1359 = dma.hbm_to_vmem [thread:$0]  (!%p1879_p6), %s2315_s3, 512, %s1883_s22, [#allocation9], %s2301_s24, %s2301_s24, %s2302_s26  }
  0x4f   : > { %s2316_s5 = sld [smem:[#allocation28_spill]] }
  0x55   : > { %s1508_s29 = scalar_lea.hbm %s2316_s5, 512 }
  0x56   : > { %p1509_p11 = scmp.ne.s32.totalorder %s2316_s5, %s1508_s29  ;;  %p1515_p0 = scmp.lt.u32.totalorder %s1508_s29, %s2316_s5 }
  0x58   : > { %p1511_p12 = pnand %p1509_p11, %p1895_p8 }
  0x5a   : > { %p1512_p13 = pneg %p1511_p12 }
  0x5c   : > { %p1517_p2 = pnand %p1515_p0, %p1512_p13 }
  0x5e   : > { %1520 = shalt.err (!%p1517_p2)
}
  0x5f   : > { %s1521_s22 = scalar_lea.vmem %s1885_s25, 512  ;;  %p1529_p4 = scmp.lt.s32.totalorder %s1885_s25, %s1885_s25 }
  0x60   : > { %p1522_p5 = scmp.ne.s32.totalorder %s1885_s25, %s1521_s22  ;;  %p1530_p10 = scmp.lt.s32.totalorder %s1521_s22, %s1521_s22 }
  0x62   : > { %p1524_p7 = pnand %p1522_p5, %p1895_p8  ;;  %p1531_p11 = por %p1530_p10, %p1529_p4 }
  0x64   : > { %p1525_p9 = pneg %p1524_p7 }
  0x66   : > { %p1532_p12 = pnand %p1531_p11, %p1525_p9 }
  0x68   : > { %1535 = shalt.err (!%p1532_p12)
}
  0x69   : > { %1365 = dma.hbm_to_vmem [thread:$0]  (!%p1879_p6), %s2316_s5, 512, %s1885_s25, [#allocation12], %s2301_s24, %s2301_s24, %s2302_s26  }
  0x6a   : > { %s1773_s10 = smov [#allocation10]   ;;  %s1774_s28 = smov [#allocation13]  }
  0x6b   : > { %s329_s27 = sshll.u32 %s1773_s10, 4  ;;  %s358_s29 = sshll.u32 %s1774_s28, 4  ;;  %s330_s27 = int_to_ptr.vmem [resolvable:$true] %s329_s27  ;;  %s359_s29 = int_to_ptr.vmem [resolvable:$true] %s358_s29 }
  0x6c   : > { %s2317_s4 = sld [smem:[#allocation27_spill]] }
  0x72   : > { %s1536_s17 = scalar_lea.hbm %s2317_s4, 512 }
  0x73   : > { %p1537_p13 = scmp.ne.s32.totalorder %s2317_s4, %s1536_s17  ;;  %p1543_p5 = scmp.lt.u32.totalorder %s1536_s17, %s2317_s4 }
  0x75   : > { %p1539_p0 = pnand %p1537_p13, %p1895_p8 }
  0x77   : > { %p1540_p2 = pneg %p1539_p0 }
  0x79   : > { %p1545_p7 = pnand %p1543_p5, %p1540_p2 }
  0x7b   : > { %1548 = shalt.err (!%p1545_p7)
}
  0x7c   : > { %s1549_s25 = scalar_lea.vmem %s330_s27, 512  ;;  %p1557_p11 = scmp.lt.s32.totalorder %s330_s27, %s330_s27 }
  0x7d   : > { %p1550_p9 = scmp.ne.s32.totalorder %s330_s27, %s1549_s25  ;;  %p1558_p12 = scmp.lt.s32.totalorder %s1549_s25, %s1549_s25 }
  0x7f   : > { %p1552_p4 = pnand %p1550_p9, %p1895_p8  ;;  %p1559_p1 = por %p1558_p12, %p1557_p11 }
  0x81   : > { %p1553_p10 = pneg %p1552_p4 }
  0x83   : > { %p1560_p3 = pnand %p1559_p1, %p1553_p10 }
  0x85   : > { %1563 = shalt.err (!%p1560_p3)
}
  0x86   : > { %1362 = dma.hbm_to_vmem [thread:$0]  (!%p1879_p6), %s2317_s4, 512, %s330_s27, [#allocation9], %s2301_s24, %s2301_s24, %s2302_s26  }
  0x87   : > { %s1564_s30 = scalar_lea.hbm %s2292_s7, 1024 }
  0x88   : > { %p1565_p1 = scmp.ne.s32.totalorder %s2292_s7, %s1564_s30  ;;  %p1571_p0 = scmp.lt.u32.totalorder %s1564_s30, %s2292_s7 }
  0x8a   : > { %p1567_p3 = pnand %p1565_p1, %p1895_p8 }
  0x8c   : > { %p1568_p13 = pneg %p1567_p3 }
  0x8e   : > { %p1573_p2 = pnand %p1571_p0, %p1568_p13 }
  0x90   : > { %1576 = shalt.err (!%p1573_p2)
}
  0x91   : > { %s1577_s18 = scalar_lea.vmem %s359_s29, 1024  ;;  %p1585_p4 = scmp.lt.s32.totalorder %s359_s29, %s359_s29 }
  0x92   : > { %p1578_p5 = scmp.ne.s32.totalorder %s359_s29, %s1577_s18  ;;  %p1586_p10 = scmp.lt.s32.totalorder %s1577_s18, %s1577_s18 }
  0x94   : > { %p1580_p7 = pnand %p1578_p5, %p1895_p8  ;;  %p1587_p11 = por %p1586_p10, %p1585_p4 }
  0x96   : > { %p1581_p9 = pneg %p1580_p7 }
  0x98   : > { %p1588_p12 = pnand %p1587_p11, %p1581_p9 }
  0x9a   : > { %1591 = shalt.err (!%p1588_p12)
}
  0x9b   : > { %s2300_s27 = smov 256   ;;  %s1776_s11 = smov 16  }
  0x9c   : > { %1368 = dma.hbm_to_vmem [thread:$0]  (!%p1879_p6), %s2292_s7, 1024, %s359_s29, [#allocation12], %s2300_s27, %s2300_s27, %s1776_s11  }
  0x9d   : > { %s1175_s9 = sadd.s32 4294967294, %s1766_s16   ;;  %s2014_s10 = sadd.s32 1, %s1766_s16  }
  0x9e   : > { %s42_s28 = sadd.s32 1, %s1762_s15  ;;  %s39_s30 = ssub.s32 %s1766_s16, %s2014_s10 }
  0x9f   : > { %p49_p8 = scmp.ne.s32.totalorder %s1762_s15, %s1758_s14  ;;  %p40_p1 = scmp.eq.s32.totalorder %s39_s30, 0 }
  0xa0   : > { %p50_p3 = scmp.eq.s32.totalorder %s1766_s16, 0  ;;  %p55_p13 = scmp.ne.s32.totalorder %s1758_s14, %s1754_s13 }
  0xa1   : > { %p252_p0 = scmp.eq.s32.totalorder %s1863_s19, 1  ;;  %p2318_p5 = scmp.eq.s32.totalorder %s1863_s19, 0 }
  0xa2   : > { %s2026_s23 = scalar_select %p40_p1, %s1762_s15, %s42_s28  }
  0xa3   : > { %p51_p2 = por %p50_p3, %p49_p8  ;;  %p2030_p7 = por %p2318_p5, %p55_p13 }
  0xa4   : > { %p2034_p6 = por %p252_p0, %p49_p8  ;;  %p258_p9 = scmp.eq.s32.totalorder %s1175_s9, 1 }
  0xa5   : > { %p1388_p4 = scmp.lt.s32.totalorder %s1766_s16, 2  ;;  %s2040_s17 = sand.u32 1, %s1762_s15  }
  0xa6   : > { %s2320_s29 = scalar_select %p2034_p6, 1, 0 }
  0xa7   : > { %p2042_p10 = por %p258_p9, %p55_p13  ;;  %s1183_s22 = sshll.u32 %s2040_s17, 3 }
  0xa8   : > { %s1184_s18 = sshll.u32 %s1766_s16, 7  ;;  %s2322_s0 = sld [smem:[#allocation24_spill]] }
  0xa9   : > { %s2321_s21 = scalar_select %p2042_p10, 1, 0 }
  0xaa   : > { %s379_s9 = scalar_lea.vmem [#allocation2], %s1183_s22  ;;  %p2053_p11 = pnand %p1388_p4, %p51_p2 }
  0xab   : > { %s386_s28 = sshll.u32 %s379_s9, 4  ;;  %s2063_s11 = scalar_lea.hbm %s2286_s1, %s1184_s18  ;;  %s2057_s28 = int_to_ptr.vmem [resolvable:$true] %s386_s28 }
  0xac   : > { %s376_s25 = scalar_lea.sflag [#allocation3], %s2040_s17  ;;  %p1594_p8 = pneg %p2053_p11 }
  0xae   : > { %s2051_s2 = scalar_lea.hbm %s2322_s0, %s1184_s18  ;;  %s1597_s4 = scalar_lea.hbm %s2322_s0, 256 }
  0xaf   : > { %s1592_s3 = scalar_lea.hbm %s2051_s2, 128  ;;  %p1598_p13 = scmp.lt.u32.totalorder %s2051_s2, %s2322_s0 }
  0xb0   : > { %p1593_p12 = scmp.ne.s32.totalorder %s2051_s2, %s1592_s3  ;;  %p1599_p0 = scmp.lt.u32.totalorder %s1597_s4, %s1592_s3 }
  0xb1   : > { %p1601_p5 = scmp.lt.u32.totalorder %s1592_s3, %s2051_s2 }
  0xb2   : > { %p1595_p1 = pnand %p1594_p8, %p1593_p12  ;;  %p1600_p2 = por %p1599_p0, %p1598_p13 }
  0xb4   : > { %p1596_p3 = pneg %p1595_p1  ;;  %p1602_p9 = por %p1601_p5, %p1600_p2 }
  0xb6   : > { %p1603_p4 = pnand %p1602_p9, %p1596_p3 }
  0xb8   : > { %1606 = shalt.err (!%p1603_p4)
}
  0xb9   : > { %s1607_s24 = scalar_lea.vmem %s2057_s28, 128  ;;  %s1777_s26 = smov [#allocation2]  }
  0xba   : > { %p1608_p12 = scmp.ne.s32.totalorder %s2057_s28, %s1607_s24  ;;  %s1612_s18 = sshll.u32 %s1777_s26, 4  ;;  %s1613_s18 = int_to_ptr.vmem [resolvable:$false] %s1612_s18 }
  0xbb   : > { %s1614_s5 = scalar_lea.vmem %s1613_s18, 256  ;;  %p1615_p6 = scmp.lt.s32.totalorder %s2057_s28, %s1613_s18 }
  0xbc   : > { %p1610_p1 = pnand %p1608_p12, %p1594_p8  ;;  %p1616_p13 = scmp.lt.s32.totalorder %s1614_s5, %s1607_s24 }
  0xbe   : > { %p1611_p10 = pneg %p1610_p1  ;;  %p1617_p0 = por %p1616_p13, %p1615_p6 }
  0xc0   : > { %p1618_p2 = pnand %p1617_p0, %p1611_p10 }
  0xc2   : > { %1621 = shalt.err (!%p1618_p2)
}
  0xc3   : > { %1372 = dma.hbm_to_vmem [thread:$0]  (!%p2053_p11), %s2051_s2, 128, %s2057_s28, %s376_s25  }
  0xc4   : > { %s393_s3 = sand.u32 1, %s1766_s16   ;;  %s2324_s4 = smul.u32 24, %s2040_s17 }
  0xc5   : > { %s2096_s9 = scalar_lea.sflag [#allocation6], %s393_s3  ;;  %s1622_s24 = scalar_lea.hbm %s2063_s11, 384 }
  0xc6   : > { %s397_s27 = scalar_lea.vmem [#allocation5], %s2324_s4  ;;  %p1623_p6 = scmp.ne.s32.totalorder %s2063_s11, %s1622_s24 }
  0xc7   : > { %s403_s22 = sshll.u32 %s397_s27, 4  ;;  %s1627_s5 = scalar_lea.hbm %s2286_s1, 768  ;;  %s2094_s22 = int_to_ptr.vmem [resolvable:$true] %s403_s22 }
  0xc8   : > { %p1625_p10 = pnand %p1623_p6, %p1594_p8  ;;  %p1628_p5 = scmp.lt.u32.totalorder %s2063_s11, %s2286_s1 }
  0xc9   : > { %p1629_p9 = scmp.lt.u32.totalorder %s1627_s5, %s1622_s24  ;;  %p1631_p12 = scmp.lt.u32.totalorder %s1622_s24, %s2063_s11 }
  0xca   : > { %p1626_p3 = pneg %p1625_p10 }
  0xcb   : > { %p1630_p4 = por %p1629_p9, %p1628_p5 }
  0xcd   : > { %p1632_p1 = por %p1631_p12, %p1630_p4 }
  0xcf   : > { %p1633_p13 = pnand %p1632_p1, %p1626_p3 }
  0xd1   : > { %1636 = shalt.err (!%p1633_p13)
}
  0xd2   : > { %s1637_s17 = scalar_lea.vmem %s2094_s22, 384  ;;  %s1778_s28 = smov [#allocation5]  }
  0xd3   : > { %p1638_p0 = scmp.ne.s32.totalorder %s2094_s22, %s1637_s17  ;;  %s1642_s25 = sshll.u32 %s1778_s28, 4  ;;  %s1643_s25 = int_to_ptr.vmem [resolvable:$false] %s1642_s25 }
  0xd4   : > { %s1644_s0 = scalar_lea.vmem %s1643_s25, 768  ;;  %p1645_p10 = scmp.lt.s32.totalorder %s2094_s22, %s1643_s25 }
  0xd5   : > { %p1640_p2 = pnand %p1638_p0, %p1594_p8  ;;  %p1646_p5 = scmp.lt.s32.totalorder %s1644_s0, %s1637_s17 }
  0xd7   : > { %p1641_p6 = pneg %p1640_p2  ;;  %p1647_p9 = por %p1646_p5, %p1645_p10 }
  0xd9   : > { %p1648_p4 = pnand %p1647_p9, %p1641_p6 }
  0xdb   : > { %1651 = shalt.err (!%p1648_p4)
}
  0xdc   : > { %s2325_s3 = smov 8   ;;  %s2326_s4 = smov 128  }
  0xdd   : > { %s2327_s27 = smov 256   ;;  %p2328_p8 = scmp.ne.s32.totalorder %s2311_s20, 0 }
  0xde   : > { %1375 = dma.hbm_to_vmem [thread:$0]  (!%p2053_p11), %s2063_s11, 384, %s2094_s22, %s2096_s9, %s2327_s27, %s2326_s4, %s2325_s3  }
  0xdf   : > { %415 = sbr.rel (%p2328_p8) target bundleno = 1002 (0x3ea), region = 56  ;;  %s2128_s24 = sand.u32 (!%p2328_p8), 1, %s1758_s14  }
  0xe0   : > { %s1187_s26 = sshll.u32 (!%p2328_p8), %s2128_s24, 3  ;;  %s418_s18 = scalar_lea.sflag (!%p2328_p8), [#allocation3], %s2128_s24 }
  0xe1   : > { %s2134_s30 = scalar_lea.vmem (!%p2328_p8), [#allocation2], %s1187_s26 }
  0xe6   : > { %1725 = dma.done.wait (%p2030_p7), %s418_s18, 128  }
  0xe7   : > { %1727 = vsyncadd (%p2030_p7), %s418_s18, 4294967168  ;;  %s426_s20 = sand.u32 1, %s1863_s19   ;;  %s1324_s11 = smul.u32 24, %s2128_s24 }
  0xe8   : > { %s427_s22 = scalar_lea.sflag [#allocation6], %s426_s20 }
  0xe9   : > { %s2144_s9 = scalar_lea.vmem [#allocation5], %s1324_s11 }
  0xea   : > { %1729 = dma.done.wait (%p2030_p7), %s427_s22, 384  }
  0xeb   : > { %1731 = vsyncadd (%p2030_p7), %s427_s22, 4294966912  ;;  %p2329_p11 = scmp.eq.s32.totalorder %s1863_s19, 0 }
  0xed   : > { %1733 = dma.done.wait (%p2329_p11), [#allocation6], 512   ;;  %p2330_p3 = pmov %p2329_p11 }
  0xef   : > { %1735 = vsyncadd (%p2330_p3), [#allocation6], 4294966784  ;;  %p2331_p12 = pmov %p2330_p3 }
  0xf0   : > { %p2332_p1 = pmov %p2330_p3 }
  0xf1   : > { %1737 = dma.done.wait (%p2331_p12), [#allocation9], 1024  }
  0xf2   : > { %1739 = vsyncadd (%p2332_p1), [#allocation9], 4294966272  ;;  %p2333_p13 = pmov %p2332_p1 }
  0xf3   : > { %p2334_p0 = pmov %p2332_p1 }
  0xf4   : > { %1741 = dma.done.wait (%p2333_p13), [#allocation12], 1536  }
  0xf5   : > { %1743 = vsyncadd (%p2334_p0), [#allocation12], 4294965760  ;;  %v1779_v0 = vmov 0.0|0.0   ;;  %vm1780_vm0 = vmmov 0   ;;  %v1781_v1 = vmov 0.0   ;;  %v500_v2 = vld [vmem:[#allocation7] sm:$0xff] }
  0xf6   : > { %1291 = vmatprep.subr.bf16.mxu0 %v1779_v0  ;;  %1243 = vmatprep.mubr.msk.f32.mxu0 %vm1780_vm0, %v1781_v1  ;;  %v501_v3 = vld [vmem:[#allocation7 + $0x8] sm:$0xff]  ;;  %v502_v4 = vld [vmem:[#allocation7 + $0x10] sm:$0xff]  ;;  %v503_v6 = vld [vmem:[#allocation7 + $0x18] sm:$0xff]  ;;  %vm504_vm1 = vcmask 261120   ;;  %s496_s28 = scalar_lea.vmem [#allocation15], %s1324_s11  ;;  %s1207_s0 = sshll.u32 %s1863_s19, 7 }
  0xf7   : > { %1297 = vmatprep.subr.bf16.mxu1 %v1779_v0  ;;  %1260 = vmatprep.mubr.msk.f32.mxu1 %vm1780_vm0, %v1781_v1  ;;  %v1292_v5 = vpack.c.bf16 %v501_v3, %v500_v2  ;;  %v1295_v7 = vpack.c.bf16 %v503_v6, %v502_v4  ;;  %v497_v8 = vld [vmem:[%s2144_s9] sm:$0xff]  ;;  %v498_v9 = vld [vmem:[%s2144_s9 + $0x8] sm:$0xff]  ;;  %v499_v10 = vld [vmem:[%s2144_s9 + $0x10] sm:$0xff]  ;;  %s1000_s25 = sshll.u32 %s496_s28, 4  ;;  %s2335_s27 = sld [smem:[#allocation30_spill]]  ;;  %s2201_s25 = int_to_ptr.vmem [resolvable:$true] %s1000_s25 }
  0xf8   : > { %v606_v11 = vld [vmem:[#allocation8] sm:$0xff]  ;;  %v607_v12 = vld [vmem:[#allocation8 + $0x8] sm:$0xff]  ;;  %v608_v14 = vld [vmem:[#allocation8 + $0x10] sm:$0xff]  ;;  %s1652_s20 = scalar_lea.vmem %s2201_s25, 384  ;;  %p2336_p2 = scmp.ne.s32.totalorder %s2320_s29, 0 }
  0xf9   : > { %1293 = vmatpush3.bf16.msra.mxu0 %v1292_v5  ;;  %v1298_v13 = vpack.c.bf16 %v607_v12, %v606_v11  ;;  %v609_v15 = vld [vmem:[#allocation8 + $0x18] sm:$0xff]  ;;  %v695_v17 = vld [vmem:[#allocation11] sm:$0xff]  ;;  %v696_v18 = vld [vmem:[#allocation11 + $0x8] sm:$0xff]  ;;  %v870_v12 = vlaneseq  ;;  %p1653_p7 = scmp.ne.s32.totalorder %s2201_s25, %s1652_s20  ;;  %s1782_s11 = smov [#allocation15]  }
  0xfa   : > { %1294 = vmatprep.subr.bf16.mxu0 %v1779_v0  ;;  %v1301_v16 = vpack.c.bf16 %v609_v15, %v608_v14  ;;  %v691_v19 = vld [vmem:[#allocation10] sm:$0xff]  ;;  %v1304_v20 = vpack.c.bf16 %v696_v18, %v695_v17  ;;  %v692_v21 = vld [vmem:[#allocation10 + $0x8] sm:$0xff]  ;;  %v697_v22 = vld [vmem:[#allocation11 + $0x10] sm:$0xff]  ;;  %s1656_s22 = sshll.u32 %s1782_s11, 4  ;;  %s1657_s22 = int_to_ptr.vmem [resolvable:$false] %s1656_s22 }
  0xfb   : > { %1299 = vmatpush3.bf16.msra.mxu1 %v1298_v13  ;;  %v698_v23 = vld [vmem:[#allocation11 + $0x18] sm:$0xff]  ;;  %v1310_v24 = vpack.c.bf16 %v692_v21, %v691_v19  ;;  %v693_v25 = vld [vmem:[#allocation10 + $0x10] sm:$0xff]  ;;  %v690_v29 = vld [vmem:[%s2134_s30] sm:$0xff]  ;;  %v871_v13 = vshrl.u32 %v870_v12, 7  ;;  %s975_s30 = scalar_lea.sflag [#allocation16], %s2128_s24  ;;  %p1654_p6 = pnand %p1653_p7, %p2336_p2 }
  0xfc   : > { %1300 = vmatprep.subr.bf16.mxu1 %v1779_v0  ;;  %v694_v26 = vld [vmem:[#allocation10 + $0x18] sm:$0xff]  ;;  %v1307_v27 = vpack.c.bf16 %v698_v23, %v697_v22  ;;  %v861_v54 = vld [vmem:[#allocation13 + $0x8] sm:$0xff]  ;;  %v860_v57 = vld [vmem:[#allocation13] sm:$0xff]  ;;  %s1658_s9 = scalar_lea.vmem %s1657_s22, 768  ;;  %p1659_p5 = scmp.lt.s32.totalorder %s2201_s25, %s1657_s22 }
  0xfd   : > { %1296 = vmatpush3.bf16.msra.mxu0 %v1295_v7  ;;  %v1313_v28 = vpack.c.bf16 %v694_v26, %v693_v25  ;;  %v863_v55 = vld [vmem:[#allocation13 + $0x18] sm:$0xff]  ;;  %v862_v58 = vld [vmem:[#allocation13 + $0x10] sm:$0xff]  ;;  %v865_v60 = vld [vmem:[#allocation13 + $0x28] sm:$0xff]  ;;  %v872_v14 = vsub.s32 0, %v871_v13  ;;  %s2208_s18 = scalar_lea.hbm %s2335_s27, %s1207_s0  ;;  %p1655_p10 = pneg %p1654_p6 }
  0xfe   : > { %1303 = vmatprep.subr.bf16.mxu0 %v1779_v0  ;;  %v1315_v56 = vpack.c.bf16 %v863_v55, %v861_v54  ;;  %v1317_v59 = vpack.c.bf16 %v862_v58, %v860_v57  ;;  %v867_v61 = vld [vmem:[#allocation13 + $0x38] sm:$0xff]  ;;  %v864_v63 = vld [vmem:[#allocation13 + $0x20] sm:$0xff]  ;;  %p1660_p9 = scmp.lt.s32.totalorder %s1658_s9, %s1652_s20 }
  0xff   : > { %1302 = vmatpush3.bf16.msra.mxu1 %v1301_v16  ;;  %v1319_v62 = vpack.c.bf16 %v867_v61, %v865_v60  ;;  %v1202_v3 = vld [vmem:[%s2291_s6] ss:$0 sm:$0xff]  ;;  %v876_v16 = vsub.s32 1, %v871_v13 }
 0x100   : > { %1244 = vmatmul.mubr.msk.f32.vlgmr.msra.gmra.mrb[0].mxu0 %vm504_vm1, %v497_v8  ;;  %1309 = vmatprep.subr.bf16.mxu1 %v1779_v0  ;;  %v868_v15 = vld [vmem:[%s2293_s8] sm:$0x3]  ;;  %p1661_p4 = por %p1660_p9, %p1659_p5 }
 0x101   : > { %1246 = vmatprep.mubr.msk.f32.mxu0 %vm1780_vm0, %v1781_v1  ;;  %1305 = vmatpush3.bf16.msra.mxu0 %v1304_v20  ;;  %v873_v17 = vrot.slane %v868_v15, %v872_v14  ;;  %v877_v18 = vrot.slane %v868_v15, %v876_v16 }
 0x102   : > { %1261 = vmatmul.mubr.msk.f32.vlgmr.msra.gmra.mrb[0].mxu1 %vm504_vm1, %v497_v8  ;;  %1306 = vmatprep.subr.bf16.mxu0 %v1779_v0  ;;  %p1662_p8 = pnand %p1661_p4, %p1655_p10 }
 0x103   : > { %1263 = vmatprep.mubr.msk.f32.mxu1 %vm1780_vm0, %v1781_v1  ;;  %1311 = vmatpush3.bf16.msra.mxu1 %v1310_v24 }
 0x104   : > { %1247 = vmatmul.mubr.msk.f32.gmra.mrb[2].mxu0 %vm504_vm1, %v498_v9  ;;  %1312 = vmatprep.subr.bf16.mxu1 %v1779_v0  ;;  %v866_v0 = vld [vmem:[#allocation13 + $0x30] sm:$0xff] }
 0x105   : > { %1249 = vmatprep.mubr.msk.f32.mxu0 %vm1780_vm0, %v1781_v1  ;;  %1308 = vmatpush3.bf16.msra.mxu0 %v1307_v27 }
 0x106   : > { %1264 = vmatmul.mubr.msk.f32.gmra.mrb[2].mxu1 %vm504_vm1, %v498_v9  ;;  %1316 = vmatprep.subr.bf16.mxu0 %v1315_v56 }
 0x107   : > { %1266 = vmatprep.mubr.msk.f32.mxu1 %vm1780_vm0, %v1781_v1  ;;  %1314 = vmatpush3.bf16.msra.mxu1 %v1313_v28 }
 0x108   : > { %1250 = vmatmul.mubr.msk.f32.gmra.mrb[4].mxu0 %vm504_vm1, %v499_v10 }
 0x109   : > { %1277 = vmatprep.mubr.msk.f32.mxu0 %vm1780_vm0, %v1781_v1 }
 0x10a   : > { %1267 = vmatmul.mubr.msk.f32.gmra.mrb[4].mxu1 %vm504_vm1, %v499_v10 }
 0x10b   : > { %1288 = vmatprep.mubr.msk.f32.mxu1 %vm1780_vm0, %v1781_v1 }
 0x10e   : > { %1289 = vmatmul.mubr.msk.f32.vlgmr.msra.gmra.mrb[6].mxu1 %vm504_vm1, %v690_v29 }
 0x1d3   : > { %v580_v30 = vpop.f32.mrb[0].mxu0 }
 0x1d4   : > { %v1245_v31 = vpop.f32.mrb[1].mxu0  ;;  %v594_v33 = vmul.f32 %v580_v30, %v580_v30 }
 0x1d5   : > { %v676_v46 = vpop.f32.mrb[0].mxu1 }
 0x1d6   : > { %v1262_v47 = vpop.f32.mrb[1].mxu1 }
 0x1d7   : > { %v585_v32 = vpop.f32.mrb[2].mxu0 }
 0x1d8   : > { %v595_v34 = vmul.f32 %v585_v32, %v585_v32  ;;  %v1248_v35 = vpop.f32.mrb[3].mxu0 }
 0x1d9   : > { %v681_v48 = vpop.f32.mrb[2].mxu1 }
 0x1da   : > { %v597_v36 = vadd.f32 %v595_v34, %v594_v33  ;;  %v1265_v49 = vpop.f32.mrb[3].mxu1 }
 0x1db   : > { %v590_v37 = vpop.f32.mrb[4].mxu0 }
 0x1dc   : > { %v596_v38 = vmul.f32 %v590_v37, %v590_v37  ;;  %v1251_v39 = vpop.f32.mrb[5].mxu0 }
 0x1dd   : > { %v686_v50 = vpop.f32.mrb[4].mxu1 }
 0x1de   : > { %v598_v40 = vadd.f32 %v597_v36, %v596_v38  ;;  %v1268_v51 = vpop.f32.mrb[5].mxu1 }
 0x1e0   : > { %1442 = vrsqrt.f32 %v598_v40  ;;  %vm601_vm2 = vcmp.eq.f32.partialorder %v598_v40, inf  ;;  %v604_v43 = vand.u32 2147483648, %v598_v40  ;;  %vm603_vm3 = vcmp.eq.f32.partialorder %v598_v40, 0.0 }
 0x1e1   : > { %v841_v52 = vpop.f32.mrb[6].mxu1 }
 0x1e2   : > { %v1290_v53 = vpop.f32.mrb[7].mxu1 }
 0x1ea   : > { %v1443_v41 = vpop.eup %1442 }
 0x1eb   : > { %v600_v42 = vmul.f32 %v1443_v41, %v598_v40 }
 0x1ed   : > { %v602_v44 = vsel %vm601_vm2, %v598_v40, %v600_v42 }
 0x1ee   : > { %v605_v45 = vsel %vm603_vm3, %v604_v43, %v602_v44 }
 0x1ef   : > { %1278 = vmatmul.mubr.msk.f32.vlgmr.msra.gmra.mrb[6].mxu0 %vm504_vm1, %v605_v45 }
 0x1f0   : > { %947 = vmatprep.mubr.f32.mxu0 %v1781_v1  ;;  %1318 = vmatpush1.bf16.msra.mxu0 %v1317_v59  ;;  %v1321_v1 = vpack.c.bf16 %v866_v0, %v864_v63 }
 0x1f1   : > { %1320 = vmatprep.subr.bf16.mxu0 %v1319_v62 }
 0x1f4   : > { %1322 = vmatpush1.bf16.msra.mxu0 %v1321_v1 }
 0x2c2   : > { %v768_v2 = vpop.f32.mrb[6].mxu0 }
 0x2c3   : > { %v842_v4 = vadd.f32 %v841_v52, %v768_v2  ;;  %v1279_v5 = vpop.f32.mrb[7].mxu0 }
 0x2c5   : > { %v852_v6 = vadd.f32 %v1202_v3, %v842_v4 }
 0x2c7   : > { %v1203_v7 = vmul.f32 -1.442695, %v852_v6 }
 0x2c9   : > { %1444 = vpow2.f32 %v1203_v7 }
 0x2d3   : > { %v1445_v8 = vpop.eup %1444 }
 0x2d4   : > { %v856_v9 = vadd.f32 1.0, %v1445_v8 }
 0x2d6   : > { %1446 = vrcp.f32 %v856_v9 }
 0x2e0   : > { %v1447_v10 = vpop.eup %1446 }
 0x2e1   : > { %v859_v11 = vmul.f32 %v1447_v10, %v852_v6 }
 0x2e3   : > { %1204 = vmatmul.mubr.msk.f32.vlgmr.msra.gmra.mrb[8].mxu0 %vm504_vm1, %v859_v11 }
 0x3b6   : > { %v949_v19 = vpop.f32.mrb[8].mxu0 }
 0x3b7   : > { %v950_v20 = vadd.f32 %v949_v19, %v873_v17  ;;  %v951_v21 = vpop.f32.mrb[9].mxu0 }
 0x3b8   : > { %v952_v22 = vadd.f32 %v951_v21, %v877_v18 }
 0x3b9   : > { %v1205_v23 = vmul.f32 -1.442695, %v950_v20 }
 0x3ba   : > { %v954_v24 = vmul.f32 %v952_v22, %v676_v46  ;;  %v955_v25 = vmul.f32 %v952_v22, %v681_v48  ;;  %v956_v26 = vmul.f32 %v952_v22, %v686_v50 }
 0x3bb   : > { %1448 = vpow2.f32 %v1205_v23 }
 0x3bc   : > { %957 = vst [vmem:[%s496_s28] sm:$0xff] %v954_v24  ;;  %958 = vst [vmem:[%s496_s28 + $0x8] sm:$0xff] %v955_v25 }
 0x3bd   : > { %959 = vst [vmem:[%s496_s28 + $0x10] sm:$0xff] %v956_v26 }
 0x3be   : > { %1665 = shalt.err (!%p1662_p8)
}
 0x3bf   : > { %s1666_s12 = scalar_lea.hbm %s2208_s18, 384  ;;  %s1670_s17 = scalar_lea.hbm %s2335_s27, 768 }
 0x3c0   : > { %p1667_p11 = scmp.ne.s32.totalorder %s2208_s18, %s1666_s12  ;;  %p1671_p1 = scmp.lt.u32.totalorder %s2208_s18, %s2335_s27 }
 0x3c1   : > { %p1672_p13 = scmp.lt.u32.totalorder %s1670_s17, %s1666_s12  ;;  %p1674_p7 = scmp.lt.u32.totalorder %s1666_s12, %s2208_s18 }
 0x3c2   : > { %p1668_p3 = pnand %p1667_p11, %p2336_p2 }
 0x3c3   : > { %p1673_p0 = por %p1672_p13, %p1671_p1 }
 0x3c4   : > { %p1669_p12 = pneg %p1668_p3 }
 0x3c5   : > { %p1675_p6 = por %p1674_p7, %p1673_p0 }
 0x3c7   : > { %p1676_p10 = pnand %p1675_p6, %p1669_p12 }
 0x3c9   : > { %1679 = shalt.err (!%p1676_p10)
}
 0x3ca   : > { %s1783_s4 = smov 128   ;;  %s1784_s20 = smov 256   ;;  %v1449_v27 = vpop.eup %1448 }
 0x3cb   : > { %s1785_s11 = smov 8   ;;  %v963_v28 = vadd.f32 1.0, %v1449_v27  ;;  %s489_s22 = scalar_lea.vmem [#allocation14], %s1187_s26 }
 0x3cc   : > { %1350 = dma.vmem_to_hbm [thread:$0]  (%p2336_p2), %s2201_s25, 384, %s2208_s18, %s975_s30, %s1783_s4, %s1784_s20, %s1785_s11  }
 0x3cd   : > { %1450 = vrcp.f32 %v963_v28  ;;  %s988_s9 = sshll.u32 %s489_s22, 4  ;;  %s2337_s2 = sld [smem:[#allocation29_spill]]  ;;  %s2243_s9 = int_to_ptr.vmem [resolvable:$true] %s988_s9 }
 0x3ce   : > { %s970_s25 = scalar_lea.sflag [#allocation4], %s2128_s24  ;;  %s1680_s18 = scalar_lea.vmem %s2243_s9, 128 }
 0x3cf   : > { %p1681_p5 = scmp.ne.s32.totalorder %s2243_s9, %s1680_s18  ;;  %s1786_s26 = smov [#allocation14]  }
 0x3d0   : > { %s1684_s30 = sshll.u32 %s1786_s26, 4  ;;  %s1685_s30 = int_to_ptr.vmem [resolvable:$false] %s1684_s30 }
 0x3d1   : > { %p1682_p9 = pnand %p1681_p5, %p2336_p2  ;;  %s1686_s19 = scalar_lea.vmem %s1685_s30, 256 }
 0x3d2   : > { %p1687_p8 = scmp.lt.s32.totalorder %s2243_s9, %s1685_s30  ;;  %p1688_p11 = scmp.lt.s32.totalorder %s1686_s19, %s1680_s18 }
 0x3d3   : > { %s2241_s17 = scalar_lea.hbm %s2337_s2, %s1207_s0  ;;  %p1683_p4 = pneg %p1682_p9 }
 0x3d4   : > { %p1689_p3 = por %p1688_p11, %p1687_p8 }
 0x3d6   : > { %p1690_p12 = pnand %p1689_p3, %p1683_p4 }
 0x3d7   : > { %v1451_v29 = vpop.eup %1450 }
 0x3d8   : > { %v966_v30 = vmul.f32 %v1451_v29, %v950_v20 }
 0x3da   : > { %v967_v31 = vmul.f32 1.6666666, %v966_v30 }
 0x3dc   : > { %968 = vst [vmem:[%s489_s22] sm:$0xff] %v967_v31 }
 0x3dd   : > { %1693 = shalt.err (!%p1690_p12)
}
 0x3de   : > { %s1694_s24 = scalar_lea.hbm %s2241_s17, 128  ;;  %s1698_s3 = scalar_lea.hbm %s2337_s2, 256 }
 0x3df   : > { %p1695_p1 = scmp.ne.s32.totalorder %s2241_s17, %s1694_s24  ;;  %p1699_p7 = scmp.lt.u32.totalorder %s2241_s17, %s2337_s2 }
 0x3e0   : > { %p1700_p6 = scmp.lt.u32.totalorder %s1698_s3, %s1694_s24  ;;  %p1702_p5 = scmp.lt.u32.totalorder %s1694_s24, %s2241_s17 }
 0x3e1   : > { %p1696_p13 = pnand %p1695_p1, %p2336_p2 }
 0x3e2   : > { %p1701_p10 = por %p1700_p6, %p1699_p7 }
 0x3e3   : > { %p1697_p0 = pneg %p1696_p13 }
 0x3e4   : > { %p1703_p9 = por %p1702_p5, %p1701_p10 }
 0x3e6   : > { %p1704_p4 = pnand %p1703_p9, %p1697_p0 }
 0x3e8   : > { %1707 = shalt.err (!%p1704_p4)
}
 0x3e9   : > { %1349 = dma.vmem_to_hbm [thread:$0]  (%p2336_p2), %s2243_s9, 128, %s2241_s17, %s970_s25  }
 0x3ea PF: > { %s1015_s11 = sand.u32 1, %s1754_s13   ;;  %p2338_p8 = scmp.ne.s32.totalorder %s2321_s21, 0 }
 0x3eb   : > { %p2339_p11 = scmp.ge.s32.totalorder %s1766_s16, 2  ;;  %s1016_s22 = scalar_lea.sflag [#allocation4], %s1015_s11 }
 0x3ed   : > { %p1377_p3 = pnand %p2339_p11, %p2338_p8 }
 0x3ef   : > { %1745 = dma.done.wait (!%p1377_p3), %s1016_s22, 128  }
 0x3f0   : > { %1747 = vsyncadd (!%p1377_p3), %s1016_s22, 4294967168  ;;  %s1025_s12 = scalar_lea.sflag [#allocation16], %s1015_s11 }
 0x3f1   : > { %1749 = dma.done.wait (!%p1377_p3), %s1025_s12, 384  }
 0x3f2   : > { %1751 = vsyncadd (!%p1377_p3), %s1025_s12, 4294966912  ;;  %p32_p2 = scmp.ge.s32.totalorder %s2014_s10, 4   ;;  %s2340_s13 = smov %s1758_s14 }
 0x3f3   : > { %s2341_s14 = smov %s1762_s15  ;;  %s2342_s15 = smov %s2026_s23 }
 0x3f4   : > { %s2343_s16 = smov %s2014_s10  ;;  %34 = sbr.rel (!%p32_p2) target bundleno = 19 (0x13), region = 151 }
 0x3fb   :  { %1030 = vsyncpa [#allocation3], 1 }
 0x3fc   :  { %1032 = vsyncpa [#allocation3 + $0x1], 1 }
 0x3fd   :  { %1033 = vsyncpa [#allocation6], 1 }
 0x3fe   :  { %1035 = vsyncpa [#allocation6 + $0x1], 1 }
 0x3ff   :  { %1036 = vsyncpa [#allocation9], 1 }
 0x400   :  { %1037 = vsyncpa [#allocation12], 1 }
 0x401   :  { %1038 = vsyncpa [#allocation4], 1 }
 0x402   :  { %1040 = vsyncpa [#allocation4 + $0x1], 1 }
 0x403   :  { %1041 = vsyncpa [#allocation16], 1 }
 0x404   :  { %1043 = vsyncpa [#allocation16 + $0x1], 1 }

// kernel: tpu_custom_call.1
= control target key start
LH: loop header
LB: loop body
LE: loop exit
PB: predicated region body
PF: predicated region fallthrough
CT: control target
= control target key end

     0   :  { %s2285_s0 = inlined_call_operand.hbm [shape: f32[16,32], index: 0, kind: input, shape index: {}]   ;;  %s2286_s1 = inlined_call_operand.hbm [shape: f32[3,16,32], index: 1, kind: input, shape index: {}]   ;;  %s2287_s2 = inlined_call_operand.hbm [shape: f32[32,32], index: 2, kind: input, shape index: {}]   ;;  %s2288_s3 = inlined_call_operand.hbm [shape: f32[32,128], index: 3, kind: input, shape index: {}]   ;;  %s2289_s4 = inlined_call_operand.hbm [shape: f32[32,32], index: 4, kind: input, shape index: {}]   ;;  %s2290_s5 = inlined_call_operand.hbm [shape: f32[32,32], index: 5, kind: input, shape index: {}]   ;;  %s2291_s6 = inlined_call_operand.vmem [shape: f32[1,32], index: 6, kind: input, shape index: {}]   ;;  %s2292_s7 = inlined_call_operand.hbm [shape: f32[32,256], index: 7, kind: input, shape index: {}]   ;;  %s2293_s8 = inlined_call_operand.vmem [shape: f32[1,256], index: 8, kind: input, shape index: {}]   ;;  %s2294_s9 = inlined_call_operand.hbm [shape: f32[16,128], index: 9, kind: output, shape index: {0}]   ;;  %s2295_s10 = inlined_call_operand.hbm [shape: f32[3,16,128], index: 10, kind: output, shape index: {1}]  }
   0x1   :  { %2304 = sst [smem:[#allocation24_spill]] %s2285_s0 }
   0x2   :  { %2305 = sst [smem:[#allocation25_spill]] %s2287_s2 }
   0x3   :  { %2306 = sst [smem:[#allocation26_spill]] %s2288_s3 }
   0x4   :  { %2307 = sst [smem:[#allocation27_spill]] %s2289_s4 }
   0x5   :  { %2308 = sst [smem:[#allocation28_spill]] %s2290_s5 }
   0x6   :  { %2309 = sst [smem:[#allocation29_spill]] %s2294_s9 }
   0x7   :  { %2310 = sst [smem:[#allocation30_spill]] %s2295_s10 }
   0x8   :  { %16 = vsyncpa [#allocation3], 0 }
   0x9   :  { %18 = vsyncpa [#allocation3 + $0x1], 0 }
   0xa   :  { %19 = vsyncpa [#allocation6], 0 }
   0xb   :  { %21 = vsyncpa [#allocation6 + $0x1], 0 }
   0xc   :  { %22 = vsyncpa [#allocation9], 0 }
   0xd   :  { %23 = vsyncpa [#allocation12], 0 }
   0xe   :  { %24 = vsyncpa [#allocation4], 0 }
   0xf   :  { %26 = vsyncpa [#allocation4 + $0x1], 0 }
  0x10   :  { %27 = vsyncpa [#allocation16], 0 }
  0x11   :  { %29 = vsyncpa [#allocation16 + $0x1], 0  ;;  %s1842_s13 = smov 0   ;;  %s1844_s14 = smov 0  }
  0x12   :  { %s1846_s15 = smov 0   ;;  %s1848_s16 = smov 0  }
  0x13 LB: > { %s1768_s17 = smov [#allocation7]   ;;  %s1863_s19 = sadd.s32 4294967295, %s1766_s16   ;;  %s1766_s16 = sphi %s1848_s16, %s2343_s16   ;;  %s1762_s15 = sphi %s1846_s15, %s2342_s15   ;;  %s1758_s14 = sphi %s1844_s14, %s2341_s14   ;;  %s1754_s13 = sphi %s1842_s13, %s2340_s13  }
  0x14   : > { %s303_s18 = sshll.u32 %s1768_s17, 4  ;;  %p1176_p0 = scmp.ge.s32.totalorder %s1766_s16, 1  ;;  %s1868_s18 = int_to_ptr.vmem [resolvable:$true] %s303_s18 }
  0x15   : > { %p2298_p1 = scmp.eq.s32.totalorder %s1863_s19, 0  ;;  %p291_p2 = scmp.lt.s32.totalorder %s1766_s16, 3 }
  0x16   : > { %s1769_s21 = smov [#allocation8]   ;;  %s1770_s24 = smov [#allocation11]  }
  0x17   : > { %p1870_p3 = pnand %p1176_p0, %p291_p2  ;;  %s316_s22 = sshll.u32 %s1769_s21, 4  ;;  %s1883_s22 = int_to_ptr.vmem [resolvable:$true] %s316_s22 }
  0x18   : > { %s342_s25 = sshll.u32 %s1770_s24, 4  ;;  %s2313_s2 = sld [smem:[#allocation25_spill]]  ;;  %s1885_s25 = int_to_ptr.vmem [resolvable:$true] %s342_s25 }
  0x19   : > { %s2311_s20 = scalar_select %p1870_p3, 1, 0 }
  0x1a   : > { %p1353_p5 = pneg %p1870_p3 }
  0x1c   : > { %p1879_p6 = pnand %p1353_p5, %p2298_p1 }
  0x1e   : > { %s1452_s28 = scalar_lea.hbm %s2313_s2, 512  ;;  %p1895_p8 = pneg %p1879_p6 }
  0x1f   : > { %p1453_p7 = scmp.ne.s32.totalorder %s2313_s2, %s1452_s28  ;;  %p1459_p11 = scmp.lt.u32.totalorder %s1452_s28, %s2313_s2 }
  0x21   : > { %p1455_p9 = pnand %p1895_p8, %p1453_p7 }
  0x23   : > { %p1456_p10 = pneg %p1455_p9 }
  0x25   : > { %p1461_p12 = pnand %p1459_p11, %p1456_p10 }
  0x27   : > { %1464 = shalt.err (!%p1461_p12)
}
  0x28   : > { %s1465_s21 = scalar_lea.vmem %s1868_s18, 512  ;;  %p1473_p5 = scmp.lt.s32.totalorder %s1868_s18, %s1868_s18 }
  0x29   : > { %p1466_p13 = scmp.ne.s32.totalorder %s1868_s18, %s1465_s21  ;;  %p1474_p4 = scmp.lt.s32.totalorder %s1465_s21, %s1465_s21 }
  0x2b   : > { %p1468_p0 = pnand %p1466_p13, %p1895_p8  ;;  %p1475_p7 = por %p1474_p4, %p1473_p5 }
  0x2d   : > { %p1469_p2 = pneg %p1468_p0 }
  0x2f   : > { %p1476_p9 = pnand %p1475_p7, %p1469_p2 }
  0x31   : > { %1479 = shalt.err (!%p1476_p9)
}
  0x32   : > { %s2301_s24 = smov 128   ;;  %s2302_s26 = smov 8  }
  0x33   : > { %1356 = dma.hbm_to_vmem [thread:$0]  (!%p1879_p6), %s2313_s2, 512, %s1868_s18, [#allocation6], %s2301_s24, %s2301_s24, %s2302_s26  }
  0x34   : > { %s2315_s3 = sld [smem:[#allocation26_spill]] }
  0x3a   : > { %s1480_s12 = scalar_lea.hbm %s2315_s3, 512 }
  0x3b   : > { %p1481_p4 = scmp.ne.s32.totalorder %s2315_s3, %s1480_s12  ;;  %p1487_p12 = scmp.lt.u32.totalorder %s1480_s12, %s2315_s3 }
  0x3d   : > { %p1483_p10 = pnand %p1481_p4, %p1895_p8 }
  0x3f   : > { %p1484_p11 = pneg %p1483_p10 }
  0x41   : > { %p1489_p13 = pnand %p1487_p12, %p1484_p11 }
  0x43   : > { %1492 = shalt.err (!%p1489_p13)
}
  0x44   : > { %s1493_s18 = scalar_lea.vmem %s1883_s22, 512  ;;  %p1501_p7 = scmp.lt.s32.totalorder %s1883_s22, %s1883_s22 }
  0x45   : > { %p1494_p0 = scmp.ne.s32.totalorder %s1883_s22, %s1493_s18  ;;  %p1502_p9 = scmp.lt.s32.totalorder %s1493_s18, %s1493_s18 }
  0x47   : > { %p1496_p2 = pnand %p1494_p0, %p1895_p8  ;;  %p1503_p4 = por %p1502_p9, %p1501_p7 }
  0x49   : > { %p1497_p5 = pneg %p1496_p2 }
  0x4b   : > { %p1504_p10 = pnand %p1503_p4, %p1497_p5 }
  0x4d   : > { %1507 = shalt.err (!%p1504_p10)
}
  0x4e   : > { %1359 = dma.hbm_to_vmem [thread:$0]  (!%p1879_p6), %s2315_s3, 512, %s1883_s22, [#allocation9], %s2301_s24, %s2301_s24, %s2302_s26  }
  0x4f   : > { %s2316_s5 = sld [smem:[#allocation28_spill]] }
  0x55   : > { %s1508_s29 = scalar_lea.hbm %s2316_s5, 512 }
  0x56   : > { %p1509_p11 = scmp.ne.s32.totalorder %s2316_s5, %s1508_s29  ;;  %p1515_p0 = scmp.lt.u32.totalorder %s1508_s29, %s2316_s5 }
  0x58   : > { %p1511_p12 = pnand %p1509_p11, %p1895_p8 }
  0x5a   : > { %p1512_p13 = pneg %p1511_p12 }
  0x5c   : > { %p1517_p2 = pnand %p1515_p0, %p1512_p13 }
  0x5e   : > { %1520 = shalt.err (!%p1517_p2)
}
  0x5f   : > { %s1521_s22 = scalar_lea.vmem %s1885_s25, 512  ;;  %p1529_p4 = scmp.lt.s32.totalorder %s1885_s25, %s1885_s25 }
  0x60   : > { %p1522_p5 = scmp.ne.s32.totalorder %s1885_s25, %s1521_s22  ;;  %p1530_p10 = scmp.lt.s32.totalorder %s1521_s22, %s1521_s22 }
  0x62   : > { %p1524_p7 = pnand %p1522_p5, %p1895_p8  ;;  %p1531_p11 = por %p1530_p10, %p1529_p4 }
  0x64   : > { %p1525_p9 = pneg %p1524_p7 }
  0x66   : > { %p1532_p12 = pnand %p1531_p11, %p1525_p9 }
  0x68   : > { %1535 = shalt.err (!%p1532_p12)
}
  0x69   : > { %1365 = dma.hbm_to_vmem [thread:$0]  (!%p1879_p6), %s2316_s5, 512, %s1885_s25, [#allocation12], %s2301_s24, %s2301_s24, %s2302_s26  }
  0x6a   : > { %s1773_s10 = smov [#allocation10]   ;;  %s1774_s28 = smov [#allocation13]  }
  0x6b   : > { %s329_s27 = sshll.u32 %s1773_s10, 4  ;;  %s358_s29 = sshll.u32 %s1774_s28, 4  ;;  %s330_s27 = int_to_ptr.vmem [resolvable:$true] %s329_s27  ;;  %s359_s29 = int_to_ptr.vmem [resolvable:$true] %s358_s29 }
  0x6c   : > { %s2317_s4 = sld [smem:[#allocation27_spill]] }
  0x72   : > { %s1536_s17 = scalar_lea.hbm %s2317_s4, 512 }
  0x73   : > { %p1537_p13 = scmp.ne.s32.totalorder %s2317_s4, %s1536_s17  ;;  %p1543_p5 = scmp.lt.u32.totalorder %s1536_s17, %s2317_s4 }
  0x75   : > { %p1539_p0 = pnand %p1537_p13, %p1895_p8 }
  0x77   : > { %p1540_p2 = pneg %p1539_p0 }
  0x79   : > { %p1545_p7 = pnand %p1543_p5, %p1540_p2 }
  0x7b   : > { %1548 = shalt.err (!%p1545_p7)
}
  0x7c   : > { %s1549_s25 = scalar_lea.vmem %s330_s27, 512  ;;  %p1557_p11 = scmp.lt.s32.totalorder %s330_s27, %s330_s27 }
  0x7d   : > { %p1550_p9 = scmp.ne.s32.totalorder %s330_s27, %s1549_s25  ;;  %p1558_p12 = scmp.lt.s32.totalorder %s1549_s25, %s1549_s25 }
  0x7f   : > { %p1552_p4 = pnand %p1550_p9, %p1895_p8  ;;  %p1559_p1 = por %p1558_p12, %p1557_p11 }
  0x81   : > { %p1553_p10 = pneg %p1552_p4 }
  0x83   : > { %p1560_p3 = pnand %p1559_p1, %p1553_p10 }
  0x85   : > { %1563 = shalt.err (!%p1560_p3)
}
  0x86   : > { %1362 = dma.hbm_to_vmem [thread:$0]  (!%p1879_p6), %s2317_s4, 512, %s330_s27, [#allocation9], %s2301_s24, %s2301_s24, %s2302_s26  }
  0x87   : > { %s1564_s30 = scalar_lea.hbm %s2292_s7, 1024 }
  0x88   : > { %p1565_p1 = scmp.ne.s32.totalorder %s2292_s7, %s1564_s30  ;;  %p1571_p0 = scmp.lt.u32.totalorder %s1564_s30, %s2292_s7 }
  0x8a   : > { %p1567_p3 = pnand %p1565_p1, %p1895_p8 }
  0x8c   : > { %p1568_p13 = pneg %p1567_p3 }
  0x8e   : > { %p1573_p2 = pnand %p1571_p0, %p1568_p13 }
  0x90   : > { %1576 = shalt.err (!%p1573_p2)
}
  0x91   : > { %s1577_s18 = scalar_lea.vmem %s359_s29, 1024  ;;  %p1585_p4 = scmp.lt.s32.totalorder %s359_s29, %s359_s29 }
  0x92   : > { %p1578_p5 = scmp.ne.s32.totalorder %s359_s29, %s1577_s18  ;;  %p1586_p10 = scmp.lt.s32.totalorder %s1577_s18, %s1577_s18 }
  0x94   : > { %p1580_p7 = pnand %p1578_p5, %p1895_p8  ;;  %p1587_p11 = por %p1586_p10, %p1585_p4 }
  0x96   : > { %p1581_p9 = pneg %p1580_p7 }
  0x98   : > { %p1588_p12 = pnand %p1587_p11, %p1581_p9 }
  0x9a   : > { %1591 = shalt.err (!%p1588_p12)
}
  0x9b   : > { %s2300_s27 = smov 256   ;;  %s1776_s11 = smov 16  }
  0x9c   : > { %1368 = dma.hbm_to_vmem [thread:$0]  (!%p1879_p6), %s2292_s7, 1024, %s359_s29, [#allocation12], %s2300_s27, %s2300_s27, %s1776_s11  }
  0x9d   : > { %s1175_s9 = sadd.s32 4294967294, %s1766_s16   ;;  %s2014_s10 = sadd.s32 1, %s1766_s16  }
  0x9e   : > { %s42_s28 = sadd.s32 1, %s1762_s15  ;;  %s39_s30 = ssub.s32 %s1766_s16, %s2014_s10 }
  0x9f   : > { %p49_p8 = scmp.ne.s32.totalorder %s1762_s15, %s1758_s14  ;;  %p40_p1 = scmp.eq.s32.totalorder %s39_s30, 0 }
  0xa0   : > { %p50_p3 = scmp.eq.s32.totalorder %s1766_s16, 0  ;;  %p55_p13 = scmp.ne.s32.totalorder %s1758_s14, %s1754_s13 }
  0xa1   : > { %p252_p0 = scmp.eq.s32.totalorder %s1863_s19, 1  ;;  %p2318_p5 = scmp.eq.s32.totalorder %s1863_s19, 0 }
  0xa2   : > { %s2026_s23 = scalar_select %p40_p1, %s1762_s15, %s42_s28  }
  0xa3   : > { %p51_p2 = por %p50_p3, %p49_p8  ;;  %p2030_p7 = por %p2318_p5, %p55_p13 }
  0xa4   : > { %p2034_p6 = por %p252_p0, %p49_p8  ;;  %p258_p9 = scmp.eq.s32.totalorder %s1175_s9, 1 }
  0xa5   : > { %p1388_p4 = scmp.lt.s32.totalorder %s1766_s16, 2  ;;  %s2040_s17 = sand.u32 1, %s1762_s15  }
  0xa6   : > { %s2320_s29 = scalar_select %p2034_p6, 1, 0 }
  0xa7   : > { %p2042_p10 = por %p258_p9, %p55_p13  ;;  %s1183_s22 = sshll.u32 %s2040_s17, 3 }
  0xa8   : > { %s1184_s18 = sshll.u32 %s1766_s16, 7  ;;  %s2322_s0 = sld [smem:[#allocation24_spill]] }
  0xa9   : > { %s2321_s21 = scalar_select %p2042_p10, 1, 0 }
  0xaa   : > { %s379_s9 = scalar_lea.vmem [#allocation2], %s1183_s22  ;;  %p2053_p11 = pnand %p1388_p4, %p51_p2 }
  0xab   : > { %s386_s28 = sshll.u32 %s379_s9, 4  ;;  %s2063_s11 = scalar_lea.hbm %s2286_s1, %s1184_s18  ;;  %s2057_s28 = int_to_ptr.vmem [resolvable:$true] %s386_s28 }
  0xac   : > { %s376_s25 = scalar_lea.sflag [#allocation3], %s2040_s17  ;;  %p1594_p8 = pneg %p2053_p11 }
  0xae   : > { %s2051_s2 = scalar_lea.hbm %s2322_s0, %s1184_s18  ;;  %s1597_s4 = scalar_lea.hbm %s2322_s0, 256 }
  0xaf   : > { %s1592_s3 = scalar_lea.hbm %s2051_s2, 128  ;;  %p1598_p13 = scmp.lt.u32.totalorder %s2051_s2, %s2322_s0 }
  0xb0   : > { %p1593_p12 = scmp.ne.s32.totalorder %s2051_s2, %s1592_s3  ;;  %p1599_p0 = scmp.lt.u32.totalorder %s1597_s4, %s1592_s3 }
  0xb1   : > { %p1601_p5 = scmp.lt.u32.totalorder %s1592_s3, %s2051_s2 }
  0xb2   : > { %p1595_p1 = pnand %p1594_p8, %p1593_p12  ;;  %p1600_p2 = por %p1599_p0, %p1598_p13 }
  0xb4   : > { %p1596_p3 = pneg %p1595_p1  ;;  %p1602_p9 = por %p1601_p5, %p1600_p2 }
  0xb6   : > { %p1603_p4 = pnand %p1602_p9, %p1596_p3 }
  0xb8   : > { %1606 = shalt.err (!%p1603_p4)
}
  0xb9   : > { %s1607_s24 = scalar_lea.vmem %s2057_s28, 128  ;;  %s1777_s26 = smov [#allocation2]  }
  0xba   : > { %p1608_p12 = scmp.ne.s32.totalorder %s2057_s28, %s1607_s24  ;;  %s1612_s18 = sshll.u32 %s1777_s26, 4  ;;  %s1613_s18 = int_to_ptr.vmem [resolvable:$false] %s1612_s18 }
  0xbb   : > { %s1614_s5 = scalar_lea.vmem %s1613_s18, 256  ;;  %p1615_p6 = scmp.lt.s32.totalorder %s2057_s28, %s1613_s18 }
  0xbc   : > { %p1610_p1 = pnand %p1608_p12, %p1594_p8  ;;  %p1616_p13 = scmp.lt.s32.totalorder %s1614_s5, %s1607_s24 }
  0xbe   : > { %p1611_p10 = pneg %p1610_p1  ;;  %p1617_p0 = por %p1616_p13, %p1615_p6 }
  0xc0   : > { %p1618_p2 = pnand %p1617_p0, %p1611_p10 }
  0xc2   : > { %1621 = shalt.err (!%p1618_p2)
}
  0xc3   : > { %1372 = dma.hbm_to_vmem [thread:$0]  (!%p2053_p11), %s2051_s2, 128, %s2057_s28, %s376_s25  }
  0xc4   : > { %s393_s3 = sand.u32 1, %s1766_s16   ;;  %s2324_s4 = smul.u32 24, %s2040_s17 }
  0xc5   : > { %s2096_s9 = scalar_lea.sflag [#allocation6], %s393_s3  ;;  %s1622_s24 = scalar_lea.hbm %s2063_s11, 384 }
  0xc6   : > { %s397_s27 = scalar_lea.vmem [#allocation5], %s2324_s4  ;;  %p1623_p6 = scmp.ne.s32.totalorder %s2063_s11, %s1622_s24 }
  0xc7   : > { %s403_s22 = sshll.u32 %s397_s27, 4  ;;  %s1627_s5 = scalar_lea.hbm %s2286_s1, 768  ;;  %s2094_s22 = int_to_ptr.vmem [resolvable:$true] %s403_s22 }
  0xc8   : > { %p1625_p10 = pnand %p1623_p6, %p1594_p8  ;;  %p1628_p5 = scmp.lt.u32.totalorder %s2063_s11, %s2286_s1 }
  0xc9   : > { %p1629_p9 = scmp.lt.u32.totalorder %s1627_s5, %s1622_s24  ;;  %p1631_p12 = scmp.lt.u32.totalorder %s1622_s24, %s2063_s11 }
  0xca   : > { %p1626_p3 = pneg %p1625_p10 }
  0xcb   : > { %p1630_p4 = por %p1629_p9, %p1628_p5 }
  0xcd   : > { %p1632_p1 = por %p1631_p12, %p1630_p4 }
  0xcf   : > { %p1633_p13 = pnand %p1632_p1, %p1626_p3 }
  0xd1   : > { %1636 = shalt.err (!%p1633_p13)
}
  0xd2   : > { %s1637_s17 = scalar_lea.vmem %s2094_s22, 384  ;;  %s1778_s28 = smov [#allocation5]  }
  0xd3   : > { %p1638_p0 = scmp.ne.s32.totalorder %s2094_s22, %s1637_s17  ;;  %s1642_s25 = sshll.u32 %s1778_s28, 4  ;;  %s1643_s25 = int_to_ptr.vmem [resolvable:$false] %s1642_s25 }
  0xd4   : > { %s1644_s0 = scalar_lea.vmem %s1643_s25, 768  ;;  %p1645_p10 = scmp.lt.s32.totalorder %s2094_s22, %s1643_s25 }
  0xd5   : > { %p1640_p2 = pnand %p1638_p0, %p1594_p8  ;;  %p1646_p5 = scmp.lt.s32.totalorder %s1644_s0, %s1637_s17 }
  0xd7   : > { %p1641_p6 = pneg %p1640_p2  ;;  %p1647_p9 = por %p1646_p5, %p1645_p10 }
  0xd9   : > { %p1648_p4 = pnand %p1647_p9, %p1641_p6 }
  0xdb   : > { %1651 = shalt.err (!%p1648_p4)
}
  0xdc   : > { %s2325_s3 = smov 8   ;;  %s2326_s4 = smov 128  }
  0xdd   : > { %s2327_s27 = smov 256   ;;  %p2328_p8 = scmp.ne.s32.totalorder %s2311_s20, 0 }
  0xde   : > { %1375 = dma.hbm_to_vmem [thread:$0]  (!%p2053_p11), %s2063_s11, 384, %s2094_s22, %s2096_s9, %s2327_s27, %s2326_s4, %s2325_s3  }
  0xdf   : > { %415 = sbr.rel (%p2328_p8) target bundleno = 1002 (0x3ea), region = 56  ;;  %s2128_s24 = sand.u32 (!%p2328_p8), 1, %s1758_s14  }
  0xe0   : > { %s1187_s26 = sshll.u32 (!%p2328_p8), %s2128_s24, 3  ;;  %s418_s18 = scalar_lea.sflag (!%p2328_p8), [#allocation3], %s2128_s24 }
  0xe1   : > { %s2134_s30 = scalar_lea.vmem (!%p2328_p8), [#allocation2], %s1187_s26 }
  0xe6   : > { %1725 = dma.done.wait (%p2030_p7), %s418_s18, 128  }
  0xe7   : > { %1727 = vsyncadd (%p2030_p7), %s418_s18, 4294967168  ;;  %s426_s20 = sand.u32 1, %s1863_s19   ;;  %s1324_s11 = smul.u32 24, %s2128_s24 }
  0xe8   : > { %s427_s22 = scalar_lea.sflag [#allocation6], %s426_s20 }
  0xe9   : > { %s2144_s9 = scalar_lea.vmem [#allocation5], %s1324_s11 }
  0xea   : > { %1729 = dma.done.wait (%p2030_p7), %s427_s22, 384  }
  0xeb   : > { %1731 = vsyncadd (%p2030_p7), %s427_s22, 4294966912  ;;  %p2329_p11 = scmp.eq.s32.totalorder %s1863_s19, 0 }
  0xed   : > { %1733 = dma.done.wait (%p2329_p11), [#allocation6], 512   ;;  %p2330_p3 = pmov %p2329_p11 }
  0xef   : > { %1735 = vsyncadd (%p2330_p3), [#allocation6], 4294966784  ;;  %p2331_p12 = pmov %p2330_p3 }
  0xf0   : > { %p2332_p1 = pmov %p2330_p3 }
  0xf1   : > { %1737 = dma.done.wait (%p2331_p12), [#allocation9], 1024  }
  0xf2   : > { %1739 = vsyncadd (%p2332_p1), [#allocation9], 4294966272  ;;  %p2333_p13 = pmov %p2332_p1 }
  0xf3   : > { %p2334_p0 = pmov %p2332_p1 }
  0xf4   : > { %1741 = dma.done.wait (%p2333_p13), [#allocation12], 1536  }
  0xf5   : > { %1743 = vsyncadd (%p2334_p0), [#allocation12], 4294965760  ;;  %v1779_v0 = vmov 0.0|0.0   ;;  %vm1780_vm0 = vmmov 0   ;;  %v1781_v1 = vmov 0.0   ;;  %v500_v2 = vld [vmem:[#allocation7] sm:$0xff] }
  0xf6   : > { %1291 = vmatprep.subr.bf16.mxu0 %v1779_v0  ;;  %1243 = vmatprep.mubr.msk.f32.mxu0 %vm1780_vm0, %v1781_v1  ;;  %v501_v3 = vld [vmem:[#allocation7 + $0x8] sm:$0xff]  ;;  %v502_v4 = vld [vmem:[#allocation7 + $0x10] sm:$0xff]  ;;  %v503_v6 = vld [vmem:[#allocation7 + $0x18] sm:$0xff]  ;;  %vm504_vm1 = vcmask 261120   ;;  %s496_s28 = scalar_lea.vmem [#allocation15], %s1324_s11  ;;  %s1207_s0 = sshll.u32 %s1863_s19, 7 }
  0xf7   : > { %1297 = vmatprep.subr.bf16.mxu1 %v1779_v0  ;;  %1260 = vmatprep.mubr.msk.f32.mxu1 %vm1780_vm0, %v1781_v1  ;;  %v1292_v5 = vpack.c.bf16 %v501_v3, %v500_v2  ;;  %v1295_v7 = vpack.c.bf16 %v503_v6, %v502_v4  ;;  %v497_v8 = vld [vmem:[%s2144_s9] sm:$0xff]  ;;  %v498_v9 = vld [vmem:[%s2144_s9 + $0x8] sm:$0xff]  ;;  %v499_v10 = vld [vmem:[%s2144_s9 + $0x10] sm:$0xff]  ;;  %s1000_s25 = sshll.u32 %s496_s28, 4  ;;  %s2335_s27 = sld [smem:[#allocation30_spill]]  ;;  %s2201_s25 = int_to_ptr.vmem [resolvable:$true] %s1000_s25 }
  0xf8   : > { %v606_v11 = vld [vmem:[#allocation8] sm:$0xff]  ;;  %v607_v12 = vld [vmem:[#allocation8 + $0x8] sm:$0xff]  ;;  %v608_v14 = vld [vmem:[#allocation8 + $0x10] sm:$0xff]  ;;  %s1652_s20 = scalar_lea.vmem %s2201_s25, 384  ;;  %p2336_p2 = scmp.ne.s32.totalorder %s2320_s29, 0 }
  0xf9   : > { %1293 = vmatpush3.bf16.msra.mxu0 %v1292_v5  ;;  %v1298_v13 = vpack.c.bf16 %v607_v12, %v606_v11  ;;  %v609_v15 = vld [vmem:[#allocation8 + $0x18] sm:$0xff]  ;;  %v695_v17 = vld [vmem:[#allocation11] sm:$0xff]  ;;  %v696_v18 = vld [vmem:[#allocation11 + $0x8] sm:$0xff]  ;;  %v870_v12 = vlaneseq  ;;  %p1653_p7 = scmp.ne.s32.totalorder %s2201_s25, %s1652_s20  ;;  %s1782_s11 = smov [#allocation15]  }
  0xfa   : > { %1294 = vmatprep.subr.bf16.mxu0 %v1779_v0  ;;  %v1301_v16 = vpack.c.bf16 %v609_v15, %v608_v14  ;;  %v691_v19 = vld [vmem:[#allocation10] sm:$0xff]  ;;  %v1304_v20 = vpack.c.bf16 %v696_v18, %v695_v17  ;;  %v692_v21 = vld [vmem:[#allocation10 + $0x8] sm:$0xff]  ;;  %v697_v22 = vld [vmem:[#allocation11 + $0x10] sm:$0xff]  ;;  %s1656_s22 = sshll.u32 %s1782_s11, 4  ;;  %s1657_s22 = int_to_ptr.vmem [resolvable:$false] %s1656_s22 }
  0xfb   : > { %1299 = vmatpush3.bf16.msra.mxu1 %v1298_v13  ;;  %v698_v23 = vld [vmem:[#allocation11 + $0x18] sm:$0xff]  ;;  %v1310_v24 = vpack.c.bf16 %v692_v21, %v691_v19  ;;  %v693_v25 = vld [vmem:[#allocation10 + $0x10] sm:$0xff]  ;;  %v690_v29 = vld [vmem:[%s2134_s30] sm:$0xff]  ;;  %v871_v13 = vshrl.u32 %v870_v12, 7  ;;  %s975_s30 = scalar_lea.sflag [#allocation16], %s2128_s24  ;;  %p1654_p6 = pnand %p1653_p7, %p2336_p2 }
  0xfc   : > { %1300 = vmatprep.subr.bf16.mxu1 %v1779_v0  ;;  %v694_v26 = vld [vmem:[#allocation10 + $0x18] sm:$0xff]  ;;  %v1307_v27 = vpack.c.bf16 %v698_v23, %v697_v22  ;;  %v861_v54 = vld [vmem:[#allocation13 + $0x8] sm:$0xff]  ;;  %v860_v57 = vld [vmem:[#allocation13] sm:$0xff]  ;;  %s1658_s9 = scalar_lea.vmem %s1657_s22, 768  ;;  %p1659_p5 = scmp.lt.s32.totalorder %s2201_s25, %s1657_s22 }
  0xfd   : > { %1296 = vmatpush3.bf16.msra.mxu0 %v1295_v7  ;;  %v1313_v28 = vpack.c.bf16 %v694_v26, %v693_v25  ;;  %v863_v55 = vld [vmem:[#allocation13 + $0x18] sm:$0xff]  ;;  %v862_v58 = vld [vmem:[#allocation13 + $0x10] sm:$0xff]  ;;  %v865_v60 = vld [vmem:[#allocation13 + $0x28] sm:$0xff]  ;;  %v872_v14 = vsub.s32 0, %v871_v13  ;;  %s2208_s18 = scalar_lea.hbm %s2335_s27, %s1207_s0  ;;  %p1655_p10 = pneg %p1654_p6 }
  0xfe   : > { %1303 = vmatprep.subr.bf16.mxu0 %v1779_v0  ;;  %v1315_v56 = vpack.c.bf16 %v863_v55, %v861_v54  ;;  %v1317_v59 = vpack.c.bf16 %v862_v58, %v860_v57  ;;  %v867_v61 = vld [vmem:[#allocation13 + $0x38] sm:$0xff]  ;;  %v864_v63 = vld [vmem:[#allocation13 + $0x20] sm:$0xff]  ;;  %p1660_p9 = scmp.lt.s32.totalorder %s1658_s9, %s1652_s20 }
  0xff   : > { %1302 = vmatpush3.bf16.msra.mxu1 %v1301_v16  ;;  %v1319_v62 = vpack.c.bf16 %v867_v61, %v865_v60  ;;  %v1202_v3 = vld [vmem:[%s2291_s6] ss:$0 sm:$0xff]  ;;  %v876_v16 = vsub.s32 1, %v871_v13 }
 0x100   : > { %1244 = vmatmul.mubr.msk.f32.vlgmr.msra.gmra.mrb[0].mxu0 %vm504_vm1, %v497_v8  ;;  %1309 = vmatprep.subr.bf16.mxu1 %v1779_v0  ;;  %v868_v15 = vld [vmem:[%s2293_s8] sm:$0x3]  ;;  %p1661_p4 = por %p1660_p9, %p1659_p5 }
 0x101   : > { %1246 = vmatprep.mubr.msk.f32.mxu0 %vm1780_vm0, %v1781_v1  ;;  %1305 = vmatpush3.bf16.msra.mxu0 %v1304_v20  ;;  %v873_v17 = vrot.slane %v868_v15, %v872_v14  ;;  %v877_v18 = vrot.slane %v868_v15, %v876_v16 }
 0x102   : > { %1261 = vmatmul.mubr.msk.f32.vlgmr.msra.gmra.mrb[0].mxu1 %vm504_vm1, %v497_v8  ;;  %1306 = vmatprep.subr.bf16.mxu0 %v1779_v0  ;;  %p1662_p8 = pnand %p1661_p4, %p1655_p10 }
 0x103   : > { %1263 = vmatprep.mubr.msk.f32.mxu1 %vm1780_vm0, %v1781_v1  ;;  %1311 = vmatpush3.bf16.msra.mxu1 %v1310_v24 }
 0x104   : > { %1247 = vmatmul.mubr.msk.f32.gmra.mrb[2].mxu0 %vm504_vm1, %v498_v9  ;;  %1312 = vmatprep.subr.bf16.mxu1 %v1779_v0  ;;  %v866_v0 = vld [vmem:[#allocation13 + $0x30] sm:$0xff] }
 0x105   : > { %1249 = vmatprep.mubr.msk.f32.mxu0 %vm1780_vm0, %v1781_v1  ;;  %1308 = vmatpush3.bf16.msra.mxu0 %v1307_v27 }
 0x106   : > { %1264 = vmatmul.mubr.msk.f32.gmra.mrb[2].mxu1 %vm504_vm1, %v498_v9  ;;  %1316 = vmatprep.subr.bf16.mxu0 %v1315_v56 }
 0x107   : > { %1266 = vmatprep.mubr.msk.f32.mxu1 %vm1780_vm0, %v1781_v1  ;;  %1314 = vmatpush3.bf16.msra.mxu1 %v1313_v28 }
 0x108   : > { %1250 = vmatmul.mubr.msk.f32.gmra.mrb[4].mxu0 %vm504_vm1, %v499_v10 }
 0x109   : > { %1277 = vmatprep.mubr.msk.f32.mxu0 %vm1780_vm0, %v1781_v1 }
 0x10a   : > { %1267 = vmatmul.mubr.msk.f32.gmra.mrb[4].mxu1 %vm504_vm1, %v499_v10 }
 0x10b   : > { %1288 = vmatprep.mubr.msk.f32.mxu1 %vm1780_vm0, %v1781_v1 }
 0x10e   : > { %1289 = vmatmul.mubr.msk.f32.vlgmr.msra.gmra.mrb[6].mxu1 %vm504_vm1, %v690_v29 }
 0x1d3   : > { %v580_v30 = vpop.f32.mrb[0].mxu0 }
 0x1d4   : > { %v1245_v31 = vpop.f32.mrb[1].mxu0  ;;  %v594_v33 = vmul.f32 %v580_v30, %v580_v30 }
 0x1d5   : > { %v676_v46 = vpop.f32.mrb[0].mxu1 }
 0x1d6   : > { %v1262_v47 = vpop.f32.mrb[1].mxu1 }
 0x1d7   : > { %v585_v32 = vpop.f32.mrb[2].mxu0 }
 0x1d8   : > { %v595_v34 = vmul.f32 %v585_v32, %v585_v32  ;;  %v1248_v35 = vpop.f32.mrb[3].mxu0 }
 0x1d9   : > { %v681_v48 = vpop.f32.mrb[2].mxu1 }
 0x1da   : > { %v597_v36 = vadd.f32 %v595_v34, %v594_v33  ;;  %v1265_v49 = vpop.f32.mrb[3].mxu1 }
 0x1db   : > { %v590_v37 = vpop.f32.mrb[4].mxu0 }
 0x1dc   : > { %v596_v38 = vmul.f32 %v590_v37, %v590_v37  ;;  %v1251_v39 = vpop.f32.mrb[5].mxu0 }
 0x1dd   : > { %v686_v50 = vpop.f32.mrb[4].mxu1 }
 0x1de   : > { %v598_v40 = vadd.f32 %v597_v36, %v596_v38  ;;  %v1268_v51 = vpop.f32.mrb[5].mxu1 }
 0x1e0   : > { %1442 = vrsqrt.f32 %v598_v40  ;;  %vm601_vm2 = vcmp.eq.f32.partialorder %v598_v40, inf  ;;  %v604_v43 = vand.u32 2147483648, %v598_v40  ;;  %vm603_vm3 = vcmp.eq.f32.partialorder %v598_v40, 0.0 }
 0x1e1   : > { %v841_v52 = vpop.f32.mrb[6].mxu1 }
 0x1e2   : > { %v1290_v53 = vpop.f32.mrb[7].mxu1 }
 0x1ea   : > { %v1443_v41 = vpop.eup %1442 }
 0x1eb   : > { %v600_v42 = vmul.f32 %v1443_v41, %v598_v40 }
 0x1ed   : > { %v602_v44 = vsel %vm601_vm2, %v598_v40, %v600_v42 }
 0x1ee   : > { %v605_v45 = vsel %vm603_vm3, %v604_v43, %v602_v44 }
 0x1ef   : > { %1278 = vmatmul.mubr.msk.f32.vlgmr.msra.gmra.mrb[6].mxu0 %vm504_vm1, %v605_v45 }
 0x1f0   : > { %947 = vmatprep.mubr.f32.mxu0 %v1781_v1  ;;  %1318 = vmatpush1.bf16.msra.mxu0 %v1317_v59  ;;  %v1321_v1 = vpack.c.bf16 %v866_v0, %v864_v63 }
 0x1f1   : > { %1320 = vmatprep.subr.bf16.mxu0 %v1319_v62 }
 0x1f4   : > { %1322 = vmatpush1.bf16.msra.mxu0 %v1321_v1 }
 0x2c2   : > { %v768_v2 = vpop.f32.mrb[6].mxu0 }
 0x2c3   : > { %v842_v4 = vadd.f32 %v841_v52, %v768_v2  ;;  %v1279_v5 = vpop.f32.mrb[7].mxu0 }
 0x2c5   : > { %v852_v6 = vadd.f32 %v1202_v3, %v842_v4 }
 0x2c7   : > { %v1203_v7 = vmul.f32 -1.442695, %v852_v6 }
 0x2c9   : > { %1444 = vpow2.f32 %v1203_v7 }
 0x2d3   : > { %v1445_v8 = vpop.eup %1444 }
 0x2d4   : > { %v856_v9 = vadd.f32 1.0, %v1445_v8 }
 0x2d6   : > { %1446 = vrcp.f32 %v856_v9 }
 0x2e0   : > { %v1447_v10 = vpop.eup %1446 }
 0x2e1   : > { %v859_v11 = vmul.f32 %v1447_v10, %v852_v6 }
 0x2e3   : > { %1204 = vmatmul.mubr.msk.f32.vlgmr.msra.gmra.mrb[8].mxu0 %vm504_vm1, %v859_v11 }
 0x3b6   : > { %v949_v19 = vpop.f32.mrb[8].mxu0 }
 0x3b7   : > { %v950_v20 = vadd.f32 %v949_v19, %v873_v17  ;;  %v951_v21 = vpop.f32.mrb[9].mxu0 }
 0x3b8   : > { %v952_v22 = vadd.f32 %v951_v21, %v877_v18 }
 0x3b9   : > { %v1205_v23 = vmul.f32 -1.442695, %v950_v20 }
 0x3ba   : > { %v954_v24 = vmul.f32 %v952_v22, %v676_v46  ;;  %v955_v25 = vmul.f32 %v952_v22, %v681_v48  ;;  %v956_v26 = vmul.f32 %v952_v22, %v686_v50 }
 0x3bb   : > { %1448 = vpow2.f32 %v1205_v23 }
 0x3bc   : > { %957 = vst [vmem:[%s496_s28] sm:$0xff] %v954_v24  ;;  %958 = vst [vmem:[%s496_s28 + $0x8] sm:$0xff] %v955_v25 }
 0x3bd   : > { %959 = vst [vmem:[%s496_s28 + $0x10] sm:$0xff] %v956_v26 }
 0x3be   : > { %1665 = shalt.err (!%p1662_p8)
}
 0x3bf   : > { %s1666_s12 = scalar_lea.hbm %s2208_s18, 384  ;;  %s1670_s17 = scalar_lea.hbm %s2335_s27, 768 }
 0x3c0   : > { %p1667_p11 = scmp.ne.s32.totalorder %s2208_s18, %s1666_s12  ;;  %p1671_p1 = scmp.lt.u32.totalorder %s2208_s18, %s2335_s27 }
 0x3c1   : > { %p1672_p13 = scmp.lt.u32.totalorder %s1670_s17, %s1666_s12  ;;  %p1674_p7 = scmp.lt.u32.totalorder %s1666_s12, %s2208_s18 }
 0x3c2   : > { %p1668_p3 = pnand %p1667_p11, %p2336_p2 }
 0x3c3   : > { %p1673_p0 = por %p1672_p13, %p1671_p1 }
 0x3c4   : > { %p1669_p12 = pneg %p1668_p3 }
 0x3c5   : > { %p1675_p6 = por %p1674_p7, %p1673_p0 }
 0x3c7   : > { %p1676_p10 = pnand %p1675_p6, %p1669_p12 }
 0x3c9   : > { %1679 = shalt.err (!%p1676_p10)
}
 0x3ca   : > { %s1783_s4 = smov 128   ;;  %s1784_s20 = smov 256   ;;  %v1449_v27 = vpop.eup %1448 }
 0x3cb   : > { %s1785_s11 = smov 8   ;;  %v963_v28 = vadd.f32 1.0, %v1449_v27  ;;  %s489_s22 = scalar_lea.vmem [#allocation14], %s1187_s26 }
 0x3cc   : > { %1350 = dma.vmem_to_hbm [thread:$0]  (%p2336_p2), %s2201_s25, 384, %s2208_s18, %s975_s30, %s1783_s4, %s1784_s20, %s1785_s11  }
 0x3cd   : > { %1450 = vrcp.f32 %v963_v28  ;;  %s988_s9 = sshll.u32 %s489_s22, 4  ;;  %s2337_s2 = sld [smem:[#allocation29_spill]]  ;;  %s2243_s9 = int_to_ptr.vmem [resolvable:$true] %s988_s9 }
 0x3ce   : > { %s970_s25 = scalar_lea.sflag [#allocation4], %s2128_s24  ;;  %s1680_s18 = scalar_lea.vmem %s2243_s9, 128 }
 0x3cf   : > { %p1681_p5 = scmp.ne.s32.totalorder %s2243_s9, %s1680_s18  ;;  %s1786_s26 = smov [#allocation14]  }
 0x3d0   : > { %s1684_s30 = sshll.u32 %s1786_s26, 4  ;;  %s1685_s30 = int_to_ptr.vmem [resolvable:$false] %s1684_s30 }
 0x3d1   : > { %p1682_p9 = pnand %p1681_p5, %p2336_p2  ;;  %s1686_s19 = scalar_lea.vmem %s1685_s30, 256 }
 0x3d2   : > { %p1687_p8 = scmp.lt.s32.totalorder %s2243_s9, %s1685_s30  ;;  %p1688_p11 = scmp.lt.s32.totalorder %s1686_s19, %s1680_s18 }
 0x3d3   : > { %s2241_s17 = scalar_lea.hbm %s2337_s2, %s1207_s0  ;;  %p1683_p4 = pneg %p1682_p9 }
 0x3d4   : > { %p1689_p3 = por %p1688_p11, %p1687_p8 }
 0x3d6   : > { %p1690_p12 = pnand %p1689_p3, %p1683_p4 }
 0x3d7   : > { %v1451_v29 = vpop.eup %1450 }
 0x3d8   : > { %v966_v30 = vmul.f32 %v1451_v29, %v950_v20 }
 0x3da   : > { %v967_v31 = vmul.f32 1.6666666, %v966_v30 }
 0x3dc   : > { %968 = vst [vmem:[%s489_s22] sm:$0xff] %v967_v31 }
 0x3dd   : > { %1693 = shalt.err (!%p1690_p12)
}
 0x3de   : > { %s1694_s24 = scalar_lea.hbm %s2241_s17, 128  ;;  %s1698_s3 = scalar_lea.hbm %s2337_s2, 256 }
 0x3df   : > { %p1695_p1 = scmp.ne.s32.totalorder %s2241_s17, %s1694_s24  ;;  %p1699_p7 = scmp.lt.u32.totalorder %s2241_s17, %s2337_s2 }
 0x3e0   : > { %p1700_p6 = scmp.lt.u32.totalorder %s1698_s3, %s1694_s24  ;;  %p1702_p5 = scmp.lt.u32.totalorder %s1694_s24, %s2241_s17 }
 0x3e1   : > { %p1696_p13 = pnand %p1695_p1, %p2336_p2 }
 0x3e2   : > { %p1701_p10 = por %p1700_p6, %p1699_p7 }
 0x3e3   : > { %p1697_p0 = pneg %p1696_p13 }
 0x3e4   : > { %p1703_p9 = por %p1702_p5, %p1701_p10 }
 0x3e6   : > { %p1704_p4 = pnand %p1703_p9, %p1697_p0 }
 0x3e8   : > { %1707 = shalt.err (!%p1704_p4)
}
 0x3e9   : > { %1349 = dma.vmem_to_hbm [thread:$0]  (%p2336_p2), %s2243_s9, 128, %s2241_s17, %s970_s25  }
 0x3ea PF: > { %s1015_s11 = sand.u32 1, %s1754_s13   ;;  %p2338_p8 = scmp.ne.s32.totalorder %s2321_s21, 0 }
 0x3eb   : > { %p2339_p11 = scmp.ge.s32.totalorder %s1766_s16, 2  ;;  %s1016_s22 = scalar_lea.sflag [#allocation4], %s1015_s11 }
 0x3ed   : > { %p1377_p3 = pnand %p2339_p11, %p2338_p8 }
 0x3ef   : > { %1745 = dma.done.wait (!%p1377_p3), %s1016_s22, 128  }
 0x3f0   : > { %1747 = vsyncadd (!%p1377_p3), %s1016_s22, 4294967168  ;;  %s1025_s12 = scalar_lea.sflag [#allocation16], %s1015_s11 }
 0x3f1   : > { %1749 = dma.done.wait (!%p1377_p3), %s1025_s12, 384  }
 0x3f2   : > { %1751 = vsyncadd (!%p1377_p3), %s1025_s12, 4294966912  ;;  %p32_p2 = scmp.ge.s32.totalorder %s2014_s10, 4   ;;  %s2340_s13 = smov %s1758_s14 }
 0x3f3   : > { %s2341_s14 = smov %s1762_s15  ;;  %s2342_s15 = smov %s2026_s23 }
 0x3f4   : > { %s2343_s16 = smov %s2014_s10  ;;  %34 = sbr.rel (!%p32_p2) target bundleno = 19 (0x13), region = 151 }
 0x3fb   :  { %1030 = vsyncpa [#allocation3], 1 }
 0x3fc   :  { %1032 = vsyncpa [#allocation3 + $0x1], 1 }
 0x3fd   :  { %1033 = vsyncpa [#allocation6], 1 }
 0x3fe   :  { %1035 = vsyncpa [#allocation6 + $0x1], 1 }
 0x3ff   :  { %1036 = vsyncpa [#allocation9], 1 }
 0x400   :  { %1037 = vsyncpa [#allocation12], 1 }
 0x401   :  { %1038 = vsyncpa [#allocation4], 1 }
 0x402   :  { %1040 = vsyncpa [#allocation4 + $0x1], 1 }
 0x403   :  { %1041 = vsyncpa [#allocation16], 1 }
 0x404   :  { %1043 = vsyncpa [#allocation16 + $0x1], 1 }

</bundles_post_ra>
